<compile_context>
chip_gen: v7x
topology: tpu7x:2x2x1
jax: 0.10.0
libtpu: 0.0.40
codegen_flags: <defaults>
</compile_context>

<pallas_src>
import functools

import jax
import jax.numpy as jnp
from jax.experimental import pallas as pl
from jax.experimental.pallas import tpu as pltpu


_MXU_DTYPE = jnp.bfloat16   # matmul operand dtype (f32 accumulate)
_T_MAX = 2048               # H*W tile (lanes); sized to fit v7x's smaller VMEM


# ----------------------------------------------------------------------------
# Pallas kernel: fused 3x3 conv (single K=9*Cin contraction) + epilogue
# ----------------------------------------------------------------------------
def _conv3x3_kernel(x_ref, w_ref, b_ref, *rest, act, mode):
    """x_ref: (1, 9*Cin, T) bf16 im2col tile, H*W on lanes.
    w_ref : (Cout, 9*Cin) bf16 folded weights (VMEM resident).
    b_ref : (Cout, 1) f32 folded bias.
    rest  : extra inputs (residual / images / input_op) followed by outputs,
            all shaped (1, Cout, T) f32.
    """
    acc = jnp.dot(w_ref[...], x_ref[0], preferred_element_type=jnp.float32)
    acc = acc + b_ref[...]                       # (Cout,1) broadcasts over T

    if act == "relu":
        acc = jnp.maximum(acc, 0.0)
    else:                                        # "sigmoid"
        acc = jax.nn.sigmoid(acc)

    if mode == "plain":
        (o_ref,) = rest
        o_ref[0] = acc.astype(o_ref.dtype)

    elif mode == "res":                          # out = res + act(conv)
        res_ref, o_ref = rest
        o_ref[0] = (res_ref[0] + acc).astype(o_ref.dtype)

    elif mode == "enh_out":
        # illumination = clamp(sigmoid(conv) + input_op, 1e-4, 1)
        # reflectance  = clamp(images / illumination, 0, 1)
        inp_ref, img_ref, illum_ref, refl_ref = rest
        illum = jnp.clip(acc + inp_ref[0], 0.0001, 1.0)
        refl = jnp.clip(img_ref[0] * pl.reciprocal(illum, approx=True),
                        0.0, 1.0)
        illum_ref[0] = illum.astype(illum_ref.dtype)
        refl_ref[0] = refl.astype(refl_ref.dtype)

    elif mode == "cal_out":
        # att = reflectance - sigmoid(conv); outputs: images+att and |att|
        refl_ref, img_ref, inp_next_ref, attabs_ref = rest
        att = refl_ref[0] - acc
        inp_next_ref[0] = (img_ref[0] + att).astype(inp_next_ref.dtype)
        attabs_ref[0] = jnp.abs(att).astype(attabs_ref.dtype)

    else:
        raise ValueError(mode)


# ----------------------------------------------------------------------------
# Wrappers (im2col / BN folding stay in plain JAX)
# ----------------------------------------------------------------------------
def _im2col_3x3(x, h, w):
    """(N, C, H*W) -> (N, 9*C, H*W), zero padding=1 ('same'), tap-major rows."""
    n, c, _ = x.shape
    xi = x.reshape(n, c, h, w)
    xp = jnp.pad(xi, ((0, 0), (0, 0), (1, 1), (1, 1)))
    cols = [xp[:, :, dh:dh + h, dw:dw + w].reshape(n, c, h * w)
            for dh in range(3) for dw in range(3)]
    return jnp.concatenate(cols, axis=1)


def _pick_hw_tile(hw):
    """Largest multiple-of-128 divisor of hw up to _T_MAX (or hw itself)."""
    if hw <= _T_MAX:
        return hw
    for t in range(_T_MAX, 127, -128):
        if hw % t == 0:
            return t
    return hw


def conv3x3(x, w2, b, *, h, w, act, mode, extras=()):
    """Fused 3x3 same conv.

    x: (N, Cin, H*W) f32; w2: (Cout, 9*Cin) f32; b: (Cout,) f32.
    extras: tuple of (N, Cout, H*W) f32 tensors consumed by the epilogue.
    Returns one or two (N, Cout, H*W) f32 arrays depending on `mode`.
    """
    n, cin, hw = x.shape
    cout = w2.shape[0]
    k = 9 * cin

    cols = _im2col_3x3(x, h, w).astype(_MXU_DTYPE)
    wq = w2.astype(_MXU_DTYPE)
    b2 = b.reshape(cout, 1).astype(jnp.float32)

    t_hw = _pick_hw_tile(hw)
    grid = (n, hw // t_hw)

    ext_spec = pl.BlockSpec((1, cout, t_hw), lambda i, j: (i, 0, j))
    in_specs = [
        pl.BlockSpec((1, k, t_hw), lambda i, j: (i, 0, j)),
        pl.BlockSpec((cout, k), lambda i, j: (0, 0)),
        pl.BlockSpec((cout, 1), lambda i, j: (0, 0)),
    ] + [ext_spec] * len(extras)

    n_out = 2 if mode in ("enh_out", "cal_out") else 1
    out_sds = jax.ShapeDtypeStruct((n, cout, hw), jnp.float32)
    if n_out == 1:
        out_shape, out_specs = out_sds, ext_spec
    else:
        out_shape, out_specs = (out_sds, out_sds), (ext_spec, ext_spec)

    kernel = functools.partial(_conv3x3_kernel, act=act, mode=mode)
    return pl.pallas_call(
        kernel,
        out_shape=out_shape,
        grid=grid,
        in_specs=in_specs,
        out_specs=out_specs,
        compiler_params=pltpu.CompilerParams(
            dimension_semantics=("parallel", "parallel")),
    )(cols, wq, b2, *extras)


# ----------------------------------------------------------------------------
# Parameter construction (matches SCI.weights_init, BN folded, eval mode)
# ----------------------------------------------------------------------------
def make_params(key):
    """Conv weight ~ N(0, 0.02), bias = 0; BN gamma ~ N(1, 0.02), beta = 0,
    running stats (0, 1), eps = 1e-5, folded into the conv."""
    keys = jax.random.split(key, 7)

    def conv_p(k, cin, cout, bn):
        kw, kg = jax.random.split(k)
        wt = 0.02 * jax.random.normal(kw, (cout, cin, 3, 3), jnp.float32)  # OIHW
        b = jnp.zeros((cout,), jnp.float32)
        if bn:
            gamma = 1.0 + 0.02 * jax.random.normal(kg, (cout,), jnp.float32)
            scale = gamma / jnp.sqrt(jnp.float32(1.0 + 1e-5))
            wt = wt * scale[:, None, None, None]
            b = b * scale
        # OIHW -> (Cout, kh, kw, Cin) -> (Cout, 9*Cin), tap-major columns.
        w2 = jnp.transpose(wt, (0, 2, 3, 1)).reshape(cout, 9 * cin)
        return w2, b

    return {
        # EnhanceNetwork(layers=1, channels=3)
        "e_in":  conv_p(keys[0], 3, 3, bn=False),    # in_conv: Conv + ReLU
        "e_blk": conv_p(keys[1], 3, 3, bn=True),     # conv:    Conv + BN + ReLU
        "e_out": conv_p(keys[2], 3, 3, bn=False),    # out_conv: Conv + Sigmoid
        # CalibrateNetwork(layers=3, channels=16), blocks share weights
        "c_in":  conv_p(keys[3], 3, 16, bn=True),
        "c_b1":  conv_p(keys[4], 16, 16, bn=True),
        "c_b2":  conv_p(keys[5], 16, 16, bn=True),
        "c_out": conv_p(keys[6], 16, 3, bn=False),
    }


# ----------------------------------------------------------------------------
# SCI forward (finetune=False path: forward_calibrate)
# ----------------------------------------------------------------------------
def enhance_net(input_op, images, p, h, w):
    fea = conv3x3(input_op, *p["e_in"], h=h, w=w, act="relu", mode="plain")
    # layers=1 -> single residual block: fea = fea + (Conv+BN+ReLU)(fea)
    fea = conv3x3(fea, *p["e_blk"], h=h, w=w, act="relu", mode="res",
                  extras=(fea,))
    # illumination = clamp(sigmoid(conv(fea)) + input_op, 1e-4, 1)
    # reflectance  = clamp(images / illumination, 0, 1)   (fused epilogue)
    illum, refl = conv3x3(fea, *p["e_out"], h=h, w=w, act="sigmoid",
                          mode="enh_out", extras=(input_op, images))
    return illum, refl


def calibrate_net(refl, images, p, h, w):
    fea = conv3x3(refl, *p["c_in"], h=h, w=w, act="relu", mode="plain")
    for _ in range(3):  # 3 residual blocks, weights shared (same nn.Sequential)
        t = conv3x3(fea, *p["c_b1"], h=h, w=w, act="relu", mode="plain")
        fea = conv3x3(t, *p["c_b2"], h=h, w=w, act="relu", mode="res",
                      extras=(fea,))
    # att = reflectance - sigmoid(conv(fea)); input_op' = images + att (fused)
    inp_next, att_abs = conv3x3(fea, *p["c_out"], h=h, w=w, act="sigmoid",
                                mode="cal_out", extras=(refl, images))
    return inp_next, att_abs


def sci_forward(images_nchw, params, stage=3):
    n, c, h, w = images_nchw.shape
    images = images_nchw.reshape(n, c, h * w)      # NCHW -> (N, C, H*W)
    ilist, rlist, inlist, attlist = [], [], [], []
    input_op = images
    for _ in range(stage):
        inlist.append(input_op)
        illum, refl = enhance_net(input_op, images, params, h, w)
        input_op, att_abs = calibrate_net(refl, images, params, h, w)
        ilist.append(illum)
        rlist.append(refl)
        attlist.append(att_abs)
    unflat = lambda lst: [t.reshape(n, c, h, w) for t in lst]
    return unflat(ilist), unflat(rlist), unflat(inlist), unflat(attlist)


# TODO(synk): SCI.load_weights (torch.load of a .pt checkpoint) is not
# reproduced; parameters are initialized in-script per SCI.weights_init.

if __name__ == "__main__":
    key = jax.random.PRNGKey(0)
    k_img, k_par = jax.random.split(key)
    # NCHW images in (0, 1], like normalized low-light photos.
    images = jax.random.uniform(k_img, (2, 3, 16, 16), jnp.float32,
                                minval=0.05, maxval=1.0)
    params = make_params(k_par)

    fwd = jax.jit(functools.partial(sci_forward, stage=3))
    ilist, rlist, inlist, attlist = fwd(images, params)
    jax.block_until_ready((ilist, rlist, inlist, attlist))

    assert len(ilist) == 3 and ilist[0].shape == (2, 3, 16, 16)
    assert rlist[0].shape == (2, 3, 16, 16)
    assert inlist[0].shape == (2, 3, 16, 16)
    assert attlist[0].shape == (2, 3, 16, 16)
    print("KERNEL_OK")
</pallas_src>

<mosaic_0001>
module attributes {stable_mosaic.version = 11 : i64} {
  func.func @_conv3x3_kernel(%arg0: i32, %arg1: i32, %arg2: memref<1x27x256xbf16, #tpu.memory_space<vmem>>, %arg3: memref<3x27xbf16, #tpu.memory_space<vmem>>, %arg4: memref<3x1xf32, #tpu.memory_space<vmem>>, %arg5: memref<1x3x256xf32, #tpu.memory_space<vmem>>) attributes {dimension_semantics = [#tpu.dimension_semantics<parallel>, #tpu.dimension_semantics<parallel>], iteration_bounds = array<i64: 2, 1>, scalar_prefetch = 0 : i64, scratch_operands = 0 : i64, tpu.core_type = #tpu.core_type<tc>, window_params = [{transform_indices = @transform_0, window_bounds = array<i64: 1, 27, 256>}, {pipeline_mode = #tpu.pipeline_mode<synchronous>, transform_indices = @transform_1, window_bounds = array<i64: 3, 27>}, {pipeline_mode = #tpu.pipeline_mode<synchronous>, transform_indices = @transform_2, window_bounds = array<i64: 3, 1>}, {transform_indices = @transform_3, window_bounds = array<i64: 1, 3, 256>}]} {
    %c0 = arith.constant 0 : index
    %c0_0 = arith.constant 0 : index
    %0 = vector.load %arg3[%c0, %c0_0] : memref<3x27xbf16, #tpu.memory_space<vmem>>, vector<3x27xbf16>
    %c0_1 = arith.constant 0 : index
    %c0_2 = arith.constant 0 : index
    %c0_3 = arith.constant 0 : index
    %1 = vector.load %arg2[%c0_1, %c0_2, %c0_3] : memref<1x27x256xbf16, #tpu.memory_space<vmem>>, vector<1x27x256xbf16>
    %2 = vector.shape_cast %1 : vector<1x27x256xbf16> to vector<27x256xbf16>
    %cst = arith.constant dense<0.000000e+00> : vector<3x256xf32>
    %3 = tpu.matmul %0, %2, %cst {dimension_numbers = #tpu.dot_dimension_numbers<[1], [0], [0], [1], [0, 0, 1, 1], [], []>} : vector<3x27xbf16>, vector<27x256xbf16>, vector<3x256xf32> -> vector<3x256xf32>
    %c0_4 = arith.constant 0 : index
    %c0_5 = arith.constant 0 : index
    %4 = vector.load %arg4[%c0_4, %c0_5] : memref<3x1xf32, #tpu.memory_space<vmem>>, vector<3x1xf32>
    %5 = vector.broadcast %4 : vector<3x1xf32> to vector<3x256xf32>
    %6 = arith.addf %3, %5 : vector<3x256xf32>
    %cst_6 = arith.constant 0.000000e+00 : f32
    %7 = vector.broadcast %cst_6 : f32 to vector<3x256xf32>
    %8 = arith.maximumf %6, %7 : vector<3x256xf32>
    %c0_7 = arith.constant 0 : index
    %c0_8 = arith.constant 0 : index
    %c0_9 = arith.constant 0 : index
    %9 = vector.load %arg5[%c0_7, %c0_8, %c0_9] : memref<1x3x256xf32, #tpu.memory_space<vmem>>, vector<1x3x256xf32>
    %10 = vector.shape_cast %9 : vector<1x3x256xf32> to vector<3x256xf32>
    %11 = vector.shape_cast %8 : vector<3x256xf32> to vector<1x3x256xf32>
    tpu.vector_store %arg5[%c0_7, %c0_8, %c0_9], %11 {strides = array<i32>} : memref<1x3x256xf32, #tpu.memory_space<vmem>>, vector<1x3x256xf32>,
    return
  }
  func.func @transform_0(%arg0: i32, %arg1: i32) -> (i32, i32, i32) {
    %c0_i32 = arith.constant 0 : i32
    %c0_i32_0 = arith.constant 0 : i32
    return %arg0, %c0_i32, %arg1 : i32, i32, i32
  }
  func.func @transform_1(%arg0: i32, %arg1: i32) -> (i32, i32) {
    %c0_i32 = arith.constant 0 : i32
    %c0_i32_0 = arith.constant 0 : i32
    %c0_i32_1 = arith.constant 0 : i32
    return %c0_i32, %c0_i32_0 : i32, i32
  }
  func.func @transform_2(%arg0: i32, %arg1: i32) -> (i32, i32) {
    %c0_i32 = arith.constant 0 : i32
    %c0_i32_0 = arith.constant 0 : i32
    %c0_i32_1 = arith.constant 0 : i32
    return %c0_i32, %c0_i32_0 : i32, i32
  }
  func.func @transform_3(%arg0: i32, %arg1: i32) -> (i32, i32, i32) {
    %c0_i32 = arith.constant 0 : i32
    %c0_i32_0 = arith.constant 0 : i32
    return %arg0, %c0_i32, %arg1 : i32, i32, i32
  }
}

module attributes {stable_mosaic.version = 11 : i64} {
  func.func @_conv3x3_kernel(%arg0: i32, %arg1: i32, %arg2: memref<1x27x256xbf16, #tpu.memory_space<vmem>>, %arg3: memref<3x27xbf16, #tpu.memory_space<vmem>>, %arg4: memref<3x1xf32, #tpu.memory_space<vmem>>, %arg5: memref<1x3x256xf32, #tpu.memory_space<vmem>>, %arg6: memref<1x3x256xf32, #tpu.memory_space<vmem>>) attributes {dimension_semantics = [#tpu.dimension_semantics<parallel>, #tpu.dimension_semantics<parallel>], iteration_bounds = array<i64: 2, 1>, scalar_prefetch = 0 : i64, scratch_operands = 0 : i64, tpu.core_type = #tpu.core_type<tc>, window_params = [{transform_indices = @transform_0, window_bounds = array<i64: 1, 27, 256>}, {pipeline_mode = #tpu.pipeline_mode<synchronous>, transform_indices = @transform_1, window_bounds = array<i64: 3, 27>}, {pipeline_mode = #tpu.pipeline_mode<synchronous>, transform_indices = @transform_2, window_bounds = array<i64: 3, 1>}, {transform_indices = @transform_3, window_bounds = array<i64: 1, 3, 256>}, {transform_indices = @transform_4, window_bounds = array<i64: 1, 3, 256>}]} {
    %c0 = arith.constant 0 : index
    %c0_0 = arith.constant 0 : index
    %0 = vector.load %arg3[%c0, %c0_0] : memref<3x27xbf16, #tpu.memory_space<vmem>>, vector<3x27xbf16>
    %c0_1 = arith.constant 0 : index
    %c0_2 = arith.constant 0 : index
    %c0_3 = arith.constant 0 : index
    %1 = vector.load %arg2[%c0_1, %c0_2, %c0_3] : memref<1x27x256xbf16, #tpu.memory_space<vmem>>, vector<1x27x256xbf16>
    %2 = vector.shape_cast %1 : vector<1x27x256xbf16> to vector<27x256xbf16>
    %cst = arith.constant dense<0.000000e+00> : vector<3x256xf32>
    %3 = tpu.matmul %0, %2, %cst {dimension_numbers = #tpu.dot_dimension_numbers<[1], [0], [0], [1], [0, 0, 1, 1], [], []>} : vector<3x27xbf16>, vector<27x256xbf16>, vector<3x256xf32> -> vector<3x256xf32>
    %c0_4 = arith.constant 0 : index
    %c0_5 = arith.constant 0 : index
    %4 = vector.load %arg4[%c0_4, %c0_5] : memref<3x1xf32, #tpu.memory_space<vmem>>, vector<3x1xf32>
    %5 = vector.broadcast %4 : vector<3x1xf32> to vector<3x256xf32>
    %6 = arith.addf %3, %5 : vector<3x256xf32>
    %cst_6 = arith.constant 0.000000e+00 : f32
    %7 = vector.broadcast %cst_6 : f32 to vector<3x256xf32>
    %8 = arith.maximumf %6, %7 : vector<3x256xf32>
    %c0_7 = arith.constant 0 : index
    %c0_8 = arith.constant 0 : index
    %c0_9 = arith.constant 0 : index
    %9 = vector.load %arg5[%c0_7, %c0_8, %c0_9] : memref<1x3x256xf32, #tpu.memory_space<vmem>>, vector<1x3x256xf32>
    %10 = vector.shape_cast %9 : vector<1x3x256xf32> to vector<3x256xf32>
    %11 = arith.addf %10, %8 : vector<3x256xf32>
    %c0_10 = arith.constant 0 : index
    %c0_11 = arith.constant 0 : index
    %c0_12 = arith.constant 0 : index
    %12 = vector.load %arg6[%c0_10, %c0_11, %c0_12] : memref<1x3x256xf32, #tpu.memory_space<vmem>>, vector<1x3x256xf32>
    %13 = vector.shape_cast %12 : vector<1x3x256xf32> to vector<3x256xf32>
    %14 = vector.shape_cast %11 : vector<3x256xf32> to vector<1x3x256xf32>
    tpu.vector_store %arg6[%c0_10, %c0_11, %c0_12], %14 {strides = array<i32>} : memref<1x3x256xf32, #tpu.memory_space<vmem>>, vector<1x3x256xf32>,
    return
  }
  func.func @transform_0(%arg0: i32, %arg1: i32) -> (i32, i32, i32) {
    %c0_i32 = arith.constant 0 : i32
    %c0_i32_0 = arith.constant 0 : i32
    return %arg0, %c0_i32, %arg1 : i32, i32, i32
  }
  func.func @transform_1(%arg0: i32, %arg1: i32) -> (i32, i32) {
    %c0_i32 = arith.constant 0 : i32
    %c0_i32_0 = arith.constant 0 : i32
    %c0_i32_1 = arith.constant 0 : i32
    return %c0_i32, %c0_i32_0 : i32, i32
  }
  func.func @transform_2(%arg0: i32, %arg1: i32) -> (i32, i32) {
    %c0_i32 = arith.constant 0 : i32
    %c0_i32_0 = arith.constant 0 : i32
    %c0_i32_1 = arith.constant 0 : i32
    return %c0_i32, %c0_i32_0 : i32, i32
  }
  func.func @transform_3(%arg0: i32, %arg1: i32) -> (i32, i32, i32) {
    %c0_i32 = arith.constant 0 : i32
    %c0_i32_0 = arith.constant 0 : i32
    return %arg0, %c0_i32, %arg1 : i32, i32, i32
  }
  func.func @transform_4(%arg0: i32, %arg1: i32) -> (i32, i32, i32) {
    %c0_i32 = arith.constant 0 : i32
    %c0_i32_0 = arith.constant 0 : i32
    return %arg0, %c0_i32, %arg1 : i32, i32, i32
  }
}

module attributes {stable_mosaic.version = 11 : i64} {
  func.func @_conv3x3_kernel(%arg0: i32, %arg1: i32, %arg2: memref<1x27x256xbf16, #tpu.memory_space<vmem>>, %arg3: memref<3x27xbf16, #tpu.memory_space<vmem>>, %arg4: memref<3x1xf32, #tpu.memory_space<vmem>>, %arg5: memref<1x3x256xf32, #tpu.memory_space<vmem>>, %arg6: memref<1x3x256xf32, #tpu.memory_space<vmem>>, %arg7: memref<1x3x256xf32, #tpu.memory_space<vmem>>, %arg8: memref<1x3x256xf32, #tpu.memory_space<vmem>>) attributes {dimension_semantics = [#tpu.dimension_semantics<parallel>, #tpu.dimension_semantics<parallel>], iteration_bounds = array<i64: 2, 1>, scalar_prefetch = 0 : i64, scratch_operands = 0 : i64, tpu.core_type = #tpu.core_type<tc>, window_params = [{transform_indices = @transform_0, window_bounds = array<i64: 1, 27, 256>}, {pipeline_mode = #tpu.pipeline_mode<synchronous>, transform_indices = @transform_1, window_bounds = array<i64: 3, 27>}, {pipeline_mode = #tpu.pipeline_mode<synchronous>, transform_indices = @transform_2, window_bounds = array<i64: 3, 1>}, {transform_indices = @transform_3, window_bounds = array<i64: 1, 3, 256>}, {transform_indices = @transform_4, window_bounds = array<i64: 1, 3, 256>}, {transform_indices = @transform_5, window_bounds = array<i64: 1, 3, 256>}, {transform_indices = @transform_6, window_bounds = array<i64: 1, 3, 256>}]} {
    %c0 = arith.constant 0 : index
    %c0_0 = arith.constant 0 : index
    %0 = vector.load %arg3[%c0, %c0_0] : memref<3x27xbf16, #tpu.memory_space<vmem>>, vector<3x27xbf16>
    %c0_1 = arith.constant 0 : index
    %c0_2 = arith.constant 0 : index
    %c0_3 = arith.constant 0 : index
    %1 = vector.load %arg2[%c0_1, %c0_2, %c0_3] : memref<1x27x256xbf16, #tpu.memory_space<vmem>>, vector<1x27x256xbf16>
    %2 = vector.shape_cast %1 : vector<1x27x256xbf16> to vector<27x256xbf16>
    %cst = arith.constant dense<0.000000e+00> : vector<3x256xf32>
    %3 = tpu.matmul %0, %2, %cst {dimension_numbers = #tpu.dot_dimension_numbers<[1], [0], [0], [1], [0, 0, 1, 1], [], []>} : vector<3x27xbf16>, vector<27x256xbf16>, vector<3x256xf32> -> vector<3x256xf32>
    %c0_4 = arith.constant 0 : index
    %c0_5 = arith.constant 0 : index
    %4 = vector.load %arg4[%c0_4, %c0_5] : memref<3x1xf32, #tpu.memory_space<vmem>>, vector<3x1xf32>
    %5 = vector.broadcast %4 : vector<3x1xf32> to vector<3x256xf32>
    %6 = arith.addf %3, %5 : vector<3x256xf32>
    %7 = arith.negf %6 : vector<3x256xf32>
    %8 = math.exp %7 : vector<3x256xf32>
    %cst_6 = arith.constant 1.000000e+00 : f32
    %9 = vector.broadcast %cst_6 : f32 to vector<3x256xf32>
    %10 = arith.addf %9, %8 : vector<3x256xf32>
    %11 = arith.divf %9, %10 : vector<3x256xf32>
    %c0_7 = arith.constant 0 : index
    %c0_8 = arith.constant 0 : index
    %c0_9 = arith.constant 0 : index
    %12 = vector.load %arg5[%c0_7, %c0_8, %c0_9] : memref<1x3x256xf32, #tpu.memory_space<vmem>>, vector<1x3x256xf32>
    %13 = vector.shape_cast %12 : vector<1x3x256xf32> to vector<3x256xf32>
    %14 = arith.addf %11, %13 : vector<3x256xf32>
    %cst_10 = arith.constant 9.99999974E-5 : f32
    %cst_11 = arith.constant 1.000000e+00 : f32
    %15 = vector.broadcast %cst_10 : f32 to vector<3x256xf32>
    %16 = arith.maximumf %15, %14 : vector<3x256xf32>
    %17 = vector.broadcast %cst_11 : f32 to vector<3x256xf32>
    %18 = arith.minimumf %17, %16 : vector<3x256xf32>
    %c0_12 = arith.constant 0 : index
    %c0_13 = arith.constant 0 : index
    %c0_14 = arith.constant 0 : index
    %19 = vector.load %arg6[%c0_12, %c0_13, %c0_14] : memref<1x3x256xf32, #tpu.memory_space<vmem>>, vector<1x3x256xf32>
    %20 = vector.shape_cast %19 : vector<1x3x256xf32> to vector<3x256xf32>
    %21 = tpu.reciprocal %18 {approx = true} : vector<3x256xf32> -> vector<3x256xf32>
    %22 = arith.mulf %20, %21 : vector<3x256xf32>
    %cst_15 = arith.constant 0.000000e+00 : f32
    %cst_16 = arith.constant 1.000000e+00 : f32
    %23 = vector.broadcast %cst_15 : f32 to vector<3x256xf32>
    %24 = arith.maximumf %23, %22 : vector<3x256xf32>
    %25 = vector.broadcast %cst_16 : f32 to vector<3x256xf32>
    %26 = arith.minimumf %25, %24 : vector<3x256xf32>
    %c0_17 = arith.constant 0 : index
    %c0_18 = arith.constant 0 : index
    %c0_19 = arith.constant 0 : index
    %27 = vector.load %arg7[%c0_17, %c0_18, %c0_19] : memref<1x3x256xf32, #tpu.memory_space<vmem>>, vector<1x3x256xf32>
    %28 = vector.shape_cast %27 : vector<1x3x256xf32> to vector<3x256xf32>
    %29 = vector.shape_cast %18 : vector<3x256xf32> to vector<1x3x256xf32>
    tpu.vector_store %arg7[%c0_17, %c0_18, %c0_19], %29 {strides = array<i32>} : memref<1x3x256xf32, #tpu.memory_space<vmem>>, vector<1x3x256xf32>,
    %c0_20 = arith.constant 0 : index
    %c0_21 = arith.constant 0 : index
    %c0_22 = arith.constant 0 : index
    %30 = vector.load %arg8[%c0_20, %c0_21, %c0_22] : memref<1x3x256xf32, #tpu.memory_space<vmem>>, vector<1x3x256xf32>
    %31 = vector.shape_cast %30 : vector<1x3x256xf32> to vector<3x256xf32>
    %32 = vector.shape_cast %26 : vector<3x256xf32> to vector<1x3x256xf32>
    tpu.vector_store %arg8[%c0_20, %c0_21, %c0_22], %32 {strides = array<i32>} : memref<1x3x256xf32, #tpu.memory_space<vmem>>, vector<1x3x256xf32>,
    return
  }
  func.func @transform_0(%arg0: i32, %arg1: i32) -> (i32, i32, i32) {
    %c0_i32 = arith.constant 0 : i32
    %c0_i32_0 = arith.constant 0 : i32
    return %arg0, %c0_i32, %arg1 : i32, i32, i32
  }
  func.func @transform_1(%arg0: i32, %arg1: i32) -> (i32, i32) {
    %c0_i32 = arith.constant 0 : i32
    %c0_i32_0 = arith.constant 0 : i32
    %c0_i32_1 = arith.constant 0 : i32
    return %c0_i32, %c0_i32_0 : i32, i32
  }
  func.func @transform_2(%arg0: i32, %arg1: i32) -> (i32, i32) {
    %c0_i32 = arith.constant 0 : i32
    %c0_i32_0 = arith.constant 0 : i32
    %c0_i32_1 = arith.constant 0 : i32
    return %c0_i32, %c0_i32_0 : i32, i32
  }
  func.func @transform_3(%arg0: i32, %arg1: i32) -> (i32, i32, i32) {
    %c0_i32 = arith.constant 0 : i32
    %c0_i32_0 = arith.constant 0 : i32
    return %arg0, %c0_i32, %arg1 : i32, i32, i32
  }
  func.func @transform_4(%arg0: i32, %arg1: i32) -> (i32, i32, i32) {
    %c0_i32 = arith.constant 0 : i32
    %c0_i32_0 = arith.constant 0 : i32
    return %arg0, %c0_i32, %arg1 : i32, i32, i32
  }
  func.func @transform_5(%arg0: i32, %arg1: i32) -> (i32, i32, i32) {
    %c0_i32 = arith.constant 0 : i32
    %c0_i32_0 = arith.constant 0 : i32
    return %arg0, %c0_i32, %arg1 : i32, i32, i32
  }
  func.func @transform_6(%arg0: i32, %arg1: i32) -> (i32, i32, i32) {
    %c0_i32 = arith.constant 0 : i32
    %c0_i32_0 = arith.constant 0 : i32
    return %arg0, %c0_i32, %arg1 : i32, i32, i32
  }
}

module attributes {stable_mosaic.version = 11 : i64} {
  func.func @_conv3x3_kernel(%arg0: i32, %arg1: i32, %arg2: memref<1x27x256xbf16, #tpu.memory_space<vmem>>, %arg3: memref<16x27xbf16, #tpu.memory_space<vmem>>, %arg4: memref<16x1xf32, #tpu.memory_space<vmem>>, %arg5: memref<1x16x256xf32, #tpu.memory_space<vmem>>) attributes {dimension_semantics = [#tpu.dimension_semantics<parallel>, #tpu.dimension_semantics<parallel>], iteration_bounds = array<i64: 2, 1>, scalar_prefetch = 0 : i64, scratch_operands = 0 : i64, tpu.core_type = #tpu.core_type<tc>, window_params = [{transform_indices = @transform_0, window_bounds = array<i64: 1, 27, 256>}, {pipeline_mode = #tpu.pipeline_mode<synchronous>, transform_indices = @transform_1, window_bounds = array<i64: 16, 27>}, {pipeline_mode = #tpu.pipeline_mode<synchronous>, transform_indices = @transform_2, window_bounds = array<i64: 16, 1>}, {transform_indices = @transform_3, window_bounds = array<i64: 1, 16, 256>}]} {
    %c0 = arith.constant 0 : index
    %c0_0 = arith.constant 0 : index
    %0 = vector.load %arg3[%c0, %c0_0] : memref<16x27xbf16, #tpu.memory_space<vmem>>, vector<16x27xbf16>
    %c0_1 = arith.constant 0 : index
    %c0_2 = arith.constant 0 : index
    %c0_3 = arith.constant 0 : index
    %1 = vector.load %arg2[%c0_1, %c0_2, %c0_3] : memref<1x27x256xbf16, #tpu.memory_space<vmem>>, vector<1x27x256xbf16>
    %2 = vector.shape_cast %1 : vector<1x27x256xbf16> to vector<27x256xbf16>
    %cst = arith.constant dense<0.000000e+00> : vector<16x256xf32>
    %3 = tpu.matmul %0, %2, %cst {dimension_numbers = #tpu.dot_dimension_numbers<[1], [0], [0], [1], [0, 0, 1, 1], [], []>} : vector<16x27xbf16>, vector<27x256xbf16>, vector<16x256xf32> -> vector<16x256xf32>
    %c0_4 = arith.constant 0 : index
    %c0_5 = arith.constant 0 : index
    %4 = vector.load %arg4[%c0_4, %c0_5] : memref<16x1xf32, #tpu.memory_space<vmem>>, vector<16x1xf32>
    %5 = vector.broadcast %4 : vector<16x1xf32> to vector<16x256xf32>
    %6 = arith.addf %3, %5 : vector<16x256xf32>
    %cst_6 = arith.constant 0.000000e+00 : f32
    %7 = vector.broadcast %cst_6 : f32 to vector<16x256xf32>
    %8 = arith.maximumf %6, %7 : vector<16x256xf32>
    %c0_7 = arith.constant 0 : index
    %c0_8 = arith.constant 0 : index
    %c0_9 = arith.constant 0 : index
    %9 = vector.load %arg5[%c0_7, %c0_8, %c0_9] : memref<1x16x256xf32, #tpu.memory_space<vmem>>, vector<1x16x256xf32>
    %10 = vector.shape_cast %9 : vector<1x16x256xf32> to vector<16x256xf32>
    %11 = vector.shape_cast %8 : vector<16x256xf32> to vector<1x16x256xf32>
    tpu.vector_store %arg5[%c0_7, %c0_8, %c0_9], %11 {strides = array<i32>} : memref<1x16x256xf32, #tpu.memory_space<vmem>>, vector<1x16x256xf32>,
    return
  }
  func.func @transform_0(%arg0: i32, %arg1: i32) -> (i32, i32, i32) {
    %c0_i32 = arith.constant 0 : i32
    %c0_i32_0 = arith.constant 0 : i32
    return %arg0, %c0_i32, %arg1 : i32, i32, i32
  }
  func.func @transform_1(%arg0: i32, %arg1: i32) -> (i32, i32) {
    %c0_i32 = arith.constant 0 : i32
    %c0_i32_0 = arith.constant 0 : i32
    %c0_i32_1 = arith.constant 0 : i32
    return %c0_i32, %c0_i32_0 : i32, i32
  }
  func.func @transform_2(%arg0: i32, %arg1: i32) -> (i32, i32) {
    %c0_i32 = arith.constant 0 : i32
    %c0_i32_0 = arith.constant 0 : i32
    %c0_i32_1 = arith.constant 0 : i32
    return %c0_i32, %c0_i32_0 : i32, i32
  }
  func.func @transform_3(%arg0: i32, %arg1: i32) -> (i32, i32, i32) {
    %c0_i32 = arith.constant 0 : i32
    %c0_i32_0 = arith.constant 0 : i32
    return %arg0, %c0_i32, %arg1 : i32, i32, i32
  }
}

module attributes {stable_mosaic.version = 11 : i64} {
  func.func @_conv3x3_kernel(%arg0: i32, %arg1: i32, %arg2: memref<1x144x256xbf16, #tpu.memory_space<vmem>>, %arg3: memref<16x144xbf16, #tpu.memory_space<vmem>>, %arg4: memref<16x1xf32, #tpu.memory_space<vmem>>, %arg5: memref<1x16x256xf32, #tpu.memory_space<vmem>>) attributes {dimension_semantics = [#tpu.dimension_semantics<parallel>, #tpu.dimension_semantics<parallel>], iteration_bounds = array<i64: 2, 1>, scalar_prefetch = 0 : i64, scratch_operands = 0 : i64, tpu.core_type = #tpu.core_type<tc>, window_params = [{transform_indices = @transform_0, window_bounds = array<i64: 1, 144, 256>}, {pipeline_mode = #tpu.pipeline_mode<synchronous>, transform_indices = @transform_1, window_bounds = array<i64: 16, 144>}, {pipeline_mode = #tpu.pipeline_mode<synchronous>, transform_indices = @transform_2, window_bounds = array<i64: 16, 1>}, {transform_indices = @transform_3, window_bounds = array<i64: 1, 16, 256>}]} {
    %c0 = arith.constant 0 : index
    %c0_0 = arith.constant 0 : index
    %0 = vector.load %arg3[%c0, %c0_0] : memref<16x144xbf16, #tpu.memory_space<vmem>>, vector<16x144xbf16>
    %c0_1 = arith.constant 0 : index
    %c0_2 = arith.constant 0 : index
    %c0_3 = arith.constant 0 : index
    %1 = vector.load %arg2[%c0_1, %c0_2, %c0_3] : memref<1x144x256xbf16, #tpu.memory_space<vmem>>, vector<1x144x256xbf16>
    %2 = vector.shape_cast %1 : vector<1x144x256xbf16> to vector<144x256xbf16>
    %cst = arith.constant dense<0.000000e+00> : vector<16x256xf32>
    %3 = tpu.matmul %0, %2, %cst {dimension_numbers = #tpu.dot_dimension_numbers<[1], [0], [0], [1], [0, 0, 1, 1], [], []>} : vector<16x144xbf16>, vector<144x256xbf16>, vector<16x256xf32> -> vector<16x256xf32>
    %c0_4 = arith.constant 0 : index
    %c0_5 = arith.constant 0 : index
    %4 = vector.load %arg4[%c0_4, %c0_5] : memref<16x1xf32, #tpu.memory_space<vmem>>, vector<16x1xf32>
    %5 = vector.broadcast %4 : vector<16x1xf32> to vector<16x256xf32>
    %6 = arith.addf %3, %5 : vector<16x256xf32>
    %cst_6 = arith.constant 0.000000e+00 : f32
    %7 = vector.broadcast %cst_6 : f32 to vector<16x256xf32>
    %8 = arith.maximumf %6, %7 : vector<16x256xf32>
    %c0_7 = arith.constant 0 : index
    %c0_8 = arith.constant 0 : index
    %c0_9 = arith.constant 0 : index
    %9 = vector.load %arg5[%c0_7, %c0_8, %c0_9] : memref<1x16x256xf32, #tpu.memory_space<vmem>>, vector<1x16x256xf32>
    %10 = vector.shape_cast %9 : vector<1x16x256xf32> to vector<16x256xf32>
    %11 = vector.shape_cast %8 : vector<16x256xf32> to vector<1x16x256xf32>
    tpu.vector_store %arg5[%c0_7, %c0_8, %c0_9], %11 {strides = array<i32>} : memref<1x16x256xf32, #tpu.memory_space<vmem>>, vector<1x16x256xf32>,
    return
  }
  func.func @transform_0(%arg0: i32, %arg1: i32) -> (i32, i32, i32) {
    %c0_i32 = arith.constant 0 : i32
    %c0_i32_0 = arith.constant 0 : i32
    return %arg0, %c0_i32, %arg1 : i32, i32, i32
  }
  func.func @transform_1(%arg0: i32, %arg1: i32) -> (i32, i32) {
    %c0_i32 = arith.constant 0 : i32
    %c0_i32_0 = arith.constant 0 : i32
    %c0_i32_1 = arith.constant 0 : i32
    return %c0_i32, %c0_i32_0 : i32, i32
  }
  func.func @transform_2(%arg0: i32, %arg1: i32) -> (i32, i32) {
    %c0_i32 = arith.constant 0 : i32
    %c0_i32_0 = arith.constant 0 : i32
    %c0_i32_1 = arith.constant 0 : i32
    return %c0_i32, %c0_i32_0 : i32, i32
  }
  func.func @transform_3(%arg0: i32, %arg1: i32) -> (i32, i32, i32) {
    %c0_i32 = arith.constant 0 : i32
    %c0_i32_0 = arith.constant 0 : i32
    return %arg0, %c0_i32, %arg1 : i32, i32, i32
  }
}

module attributes {stable_mosaic.version = 11 : i64} {
  func.func @_conv3x3_kernel(%arg0: i32, %arg1: i32, %arg2: memref<1x144x256xbf16, #tpu.memory_space<vmem>>, %arg3: memref<16x144xbf16, #tpu.memory_space<vmem>>, %arg4: memref<16x1xf32, #tpu.memory_space<vmem>>, %arg5: memref<1x16x256xf32, #tpu.memory_space<vmem>>, %arg6: memref<1x16x256xf32, #tpu.memory_space<vmem>>) attributes {dimension_semantics = [#tpu.dimension_semantics<parallel>, #tpu.dimension_semantics<parallel>], iteration_bounds = array<i64: 2, 1>, scalar_prefetch = 0 : i64, scratch_operands = 0 : i64, tpu.core_type = #tpu.core_type<tc>, window_params = [{transform_indices = @transform_0, window_bounds = array<i64: 1, 144, 256>}, {pipeline_mode = #tpu.pipeline_mode<synchronous>, transform_indices = @transform_1, window_bounds = array<i64: 16, 144>}, {pipeline_mode = #tpu.pipeline_mode<synchronous>, transform_indices = @transform_2, window_bounds = array<i64: 16, 1>}, {transform_indices = @transform_3, window_bounds = array<i64: 1, 16, 256>}, {transform_indices = @transform_4, window_bounds = array<i64: 1, 16, 256>}]} {
    %c0 = arith.constant 0 : index
    %c0_0 = arith.constant 0 : index
    %0 = vector.load %arg3[%c0, %c0_0] : memref<16x144xbf16, #tpu.memory_space<vmem>>, vector<16x144xbf16>
    %c0_1 = arith.constant 0 : index
    %c0_2 = arith.constant 0 : index
    %c0_3 = arith.constant 0 : index
    %1 = vector.load %arg2[%c0_1, %c0_2, %c0_3] : memref<1x144x256xbf16, #tpu.memory_space<vmem>>, vector<1x144x256xbf16>
    %2 = vector.shape_cast %1 : vector<1x144x256xbf16> to vector<144x256xbf16>
    %cst = arith.constant dense<0.000000e+00> : vector<16x256xf32>
    %3 = tpu.matmul %0, %2, %cst {dimension_numbers = #tpu.dot_dimension_numbers<[1], [0], [0], [1], [0, 0, 1, 1], [], []>} : vector<16x144xbf16>, vector<144x256xbf16>, vector<16x256xf32> -> vector<16x256xf32>
    %c0_4 = arith.constant 0 : index
    %c0_5 = arith.constant 0 : index
    %4 = vector.load %arg4[%c0_4, %c0_5] : memref<16x1xf32, #tpu.memory_space<vmem>>, vector<16x1xf32>
    %5 = vector.broadcast %4 : vector<16x1xf32> to vector<16x256xf32>
    %6 = arith.addf %3, %5 : vector<16x256xf32>
    %cst_6 = arith.constant 0.000000e+00 : f32
    %7 = vector.broadcast %cst_6 : f32 to vector<16x256xf32>
    %8 = arith.maximumf %6, %7 : vector<16x256xf32>
    %c0_7 = arith.constant 0 : index
    %c0_8 = arith.constant 0 : index
    %c0_9 = arith.constant 0 : index
    %9 = vector.load %arg5[%c0_7, %c0_8, %c0_9] : memref<1x16x256xf32, #tpu.memory_space<vmem>>, vector<1x16x256xf32>
    %10 = vector.shape_cast %9 : vector<1x16x256xf32> to vector<16x256xf32>
    %11 = arith.addf %10, %8 : vector<16x256xf32>
    %c0_10 = arith.constant 0 : index
    %c0_11 = arith.constant 0 : index
    %c0_12 = arith.constant 0 : index
    %12 = vector.load %arg6[%c0_10, %c0_11, %c0_12] : memref<1x16x256xf32, #tpu.memory_space<vmem>>, vector<1x16x256xf32>
    %13 = vector.shape_cast %12 : vector<1x16x256xf32> to vector<16x256xf32>
    %14 = vector.shape_cast %11 : vector<16x256xf32> to vector<1x16x256xf32>
    tpu.vector_store %arg6[%c0_10, %c0_11, %c0_12], %14 {strides = array<i32>} : memref<1x16x256xf32, #tpu.memory_space<vmem>>, vector<1x16x256xf32>,
    return
  }
  func.func @transform_0(%arg0: i32, %arg1: i32) -> (i32, i32, i32) {
    %c0_i32 = arith.constant 0 : i32
    %c0_i32_0 = arith.constant 0 : i32
    return %arg0, %c0_i32, %arg1 : i32, i32, i32
  }
  func.func @transform_1(%arg0: i32, %arg1: i32) -> (i32, i32) {
    %c0_i32 = arith.constant 0 : i32
    %c0_i32_0 = arith.constant 0 : i32
    %c0_i32_1 = arith.constant 0 : i32
    return %c0_i32, %c0_i32_0 : i32, i32
  }
  func.func @transform_2(%arg0: i32, %arg1: i32) -> (i32, i32) {
    %c0_i32 = arith.constant 0 : i32
    %c0_i32_0 = arith.constant 0 : i32
    %c0_i32_1 = arith.constant 0 : i32
    return %c0_i32, %c0_i32_0 : i32, i32
  }
  func.func @transform_3(%arg0: i32, %arg1: i32) -> (i32, i32, i32) {
    %c0_i32 = arith.constant 0 : i32
    %c0_i32_0 = arith.constant 0 : i32
    return %arg0, %c0_i32, %arg1 : i32, i32, i32
  }
  func.func @transform_4(%arg0: i32, %arg1: i32) -> (i32, i32, i32) {
    %c0_i32 = arith.constant 0 : i32
    %c0_i32_0 = arith.constant 0 : i32
    return %arg0, %c0_i32, %arg1 : i32, i32, i32
  }
}

module attributes {stable_mosaic.version = 11 : i64} {
  func.func @_conv3x3_kernel(%arg0: i32, %arg1: i32, %arg2: memref<1x144x256xbf16, #tpu.memory_space<vmem>>, %arg3: memref<3x144xbf16, #tpu.memory_space<vmem>>, %arg4: memref<3x1xf32, #tpu.memory_space<vmem>>, %arg5: memref<1x3x256xf32, #tpu.memory_space<vmem>>, %arg6: memref<1x3x256xf32, #tpu.memory_space<vmem>>, %arg7: memref<1x3x256xf32, #tpu.memory_space<vmem>>, %arg8: memref<1x3x256xf32, #tpu.memory_space<vmem>>) attributes {dimension_semantics = [#tpu.dimension_semantics<parallel>, #tpu.dimension_semantics<parallel>], iteration_bounds = array<i64: 2, 1>, scalar_prefetch = 0 : i64, scratch_operands = 0 : i64, tpu.core_type = #tpu.core_type<tc>, window_params = [{transform_indices = @transform_0, window_bounds = array<i64: 1, 144, 256>}, {pipeline_mode = #tpu.pipeline_mode<synchronous>, transform_indices = @transform_1, window_bounds = array<i64: 3, 144>}, {pipeline_mode = #tpu.pipeline_mode<synchronous>, transform_indices = @transform_2, window_bounds = array<i64: 3, 1>}, {transform_indices = @transform_3, window_bounds = array<i64: 1, 3, 256>}, {transform_indices = @transform_4, window_bounds = array<i64: 1, 3, 256>}, {transform_indices = @transform_5, window_bounds = array<i64: 1, 3, 256>}, {transform_indices = @transform_6, window_bounds = array<i64: 1, 3, 256>}]} {
    %c0 = arith.constant 0 : index
    %c0_0 = arith.constant 0 : index
    %0 = vector.load %arg3[%c0, %c0_0] : memref<3x144xbf16, #tpu.memory_space<vmem>>, vector<3x144xbf16>
    %c0_1 = arith.constant 0 : index
    %c0_2 = arith.constant 0 : index
    %c0_3 = arith.constant 0 : index
    %1 = vector.load %arg2[%c0_1, %c0_2, %c0_3] : memref<1x144x256xbf16, #tpu.memory_space<vmem>>, vector<1x144x256xbf16>
    %2 = vector.shape_cast %1 : vector<1x144x256xbf16> to vector<144x256xbf16>
    %cst = arith.constant dense<0.000000e+00> : vector<3x256xf32>
    %3 = tpu.matmul %0, %2, %cst {dimension_numbers = #tpu.dot_dimension_numbers<[1], [0], [0], [1], [0, 0, 1, 1], [], []>} : vector<3x144xbf16>, vector<144x256xbf16>, vector<3x256xf32> -> vector<3x256xf32>
    %c0_4 = arith.constant 0 : index
    %c0_5 = arith.constant 0 : index
    %4 = vector.load %arg4[%c0_4, %c0_5] : memref<3x1xf32, #tpu.memory_space<vmem>>, vector<3x1xf32>
    %5 = vector.broadcast %4 : vector<3x1xf32> to vector<3x256xf32>
    %6 = arith.addf %3, %5 : vector<3x256xf32>
    %7 = arith.negf %6 : vector<3x256xf32>
    %8 = math.exp %7 : vector<3x256xf32>
    %cst_6 = arith.constant 1.000000e+00 : f32
    %9 = vector.broadcast %cst_6 : f32 to vector<3x256xf32>
    %10 = arith.addf %9, %8 : vector<3x256xf32>
    %11 = arith.divf %9, %10 : vector<3x256xf32>
    %c0_7 = arith.constant 0 : index
    %c0_8 = arith.constant 0 : index
    %c0_9 = arith.constant 0 : index
    %12 = vector.load %arg5[%c0_7, %c0_8, %c0_9] : memref<1x3x256xf32, #tpu.memory_space<vmem>>, vector<1x3x256xf32>
    %13 = vector.shape_cast %12 : vector<1x3x256xf32> to vector<3x256xf32>
    %14 = arith.subf %13, %11 : vector<3x256xf32>
    %c0_10 = arith.constant 0 : index
    %c0_11 = arith.constant 0 : index
    %c0_12 = arith.constant 0 : index
    %15 = vector.load %arg6[%c0_10, %c0_11, %c0_12] : memref<1x3x256xf32, #tpu.memory_space<vmem>>, vector<1x3x256xf32>
    %16 = vector.shape_cast %15 : vector<1x3x256xf32> to vector<3x256xf32>
    %17 = arith.addf %16, %14 : vector<3x256xf32>
    %c0_13 = arith.constant 0 : index
    %c0_14 = arith.constant 0 : index
    %c0_15 = arith.constant 0 : index
    %18 = vector.load %arg7[%c0_13, %c0_14, %c0_15] : memref<1x3x256xf32, #tpu.memory_space<vmem>>, vector<1x3x256xf32>
    %19 = vector.shape_cast %18 : vector<1x3x256xf32> to vector<3x256xf32>
    %20 = vector.shape_cast %17 : vector<3x256xf32> to vector<1x3x256xf32>
    tpu.vector_store %arg7[%c0_13, %c0_14, %c0_15], %20 {strides = array<i32>} : memref<1x3x256xf32, #tpu.memory_space<vmem>>, vector<1x3x256xf32>,
    %21 = math.absf %14 : vector<3x256xf32>
    %c0_16 = arith.constant 0 : index
    %c0_17 = arith.constant 0 : index
    %c0_18 = arith.constant 0 : index
    %22 = vector.load %arg8[%c0_16, %c0_17, %c0_18] : memref<1x3x256xf32, #tpu.memory_space<vmem>>, vector<1x3x256xf32>
    %23 = vector.shape_cast %22 : vector<1x3x256xf32> to vector<3x256xf32>
    %24 = vector.shape_cast %21 : vector<3x256xf32> to vector<1x3x256xf32>
    tpu.vector_store %arg8[%c0_16, %c0_17, %c0_18], %24 {strides = array<i32>} : memref<1x3x256xf32, #tpu.memory_space<vmem>>, vector<1x3x256xf32>,
    return
  }
  func.func @transform_0(%arg0: i32, %arg1: i32) -> (i32, i32, i32) {
    %c0_i32 = arith.constant 0 : i32
    %c0_i32_0 = arith.constant 0 : i32
    return %arg0, %c0_i32, %arg1 : i32, i32, i32
  }
  func.func @transform_1(%arg0: i32, %arg1: i32) -> (i32, i32) {
    %c0_i32 = arith.constant 0 : i32
    %c0_i32_0 = arith.constant 0 : i32
    %c0_i32_1 = arith.constant 0 : i32
    return %c0_i32, %c0_i32_0 : i32, i32
  }
  func.func @transform_2(%arg0: i32, %arg1: i32) -> (i32, i32) {
    %c0_i32 = arith.constant 0 : i32
    %c0_i32_0 = arith.constant 0 : i32
    %c0_i32_1 = arith.constant 0 : i32
    return %c0_i32, %c0_i32_0 : i32, i32
  }
  func.func @transform_3(%arg0: i32, %arg1: i32) -> (i32, i32, i32) {
    %c0_i32 = arith.constant 0 : i32
    %c0_i32_0 = arith.constant 0 : i32
    return %arg0, %c0_i32, %arg1 : i32, i32, i32
  }
  func.func @transform_4(%arg0: i32, %arg1: i32) -> (i32, i32, i32) {
    %c0_i32 = arith.constant 0 : i32
    %c0_i32_0 = arith.constant 0 : i32
    return %arg0, %c0_i32, %arg1 : i32, i32, i32
  }
  func.func @transform_5(%arg0: i32, %arg1: i32) -> (i32, i32, i32) {
    %c0_i32 = arith.constant 0 : i32
    %c0_i32_0 = arith.constant 0 : i32
    return %arg0, %c0_i32, %arg1 : i32, i32, i32
  }
  func.func @transform_6(%arg0: i32, %arg1: i32) -> (i32, i32, i32) {
    %c0_i32 = arith.constant 0 : i32
    %c0_i32_0 = arith.constant 0 : i32
    return %arg0, %c0_i32, %arg1 : i32, i32, i32
  }
}

module attributes {stable_mosaic.version = 11 : i64} {
  func.func @_conv3x3_kernel(%arg0: i32, %arg1: i32, %arg2: memref<1x144x256xbf16, #tpu.memory_space<vmem>>, %arg3: memref<3x144xbf16, #tpu.memory_space<vmem>>, %arg4: memref<3x1xf32, #tpu.memory_space<vmem>>, %arg5: memref<1x3x256xf32, #tpu.memory_space<vmem>>, %arg6: memref<1x3x256xf32, #tpu.memory_space<vmem>>, %arg7: memref<1x3x256xf32, #tpu.memory_space<vmem>>, %arg8: memref<1x3x256xf32, #tpu.memory_space<vmem>>) attributes {dimension_semantics = [#tpu.dimension_semantics<parallel>, #tpu.dimension_semantics<parallel>], iteration_bounds = array<i64: 2, 1>, scalar_prefetch = 0 : i64, scratch_operands = 0 : i64, tpu.core_type = #tpu.core_type<tc>, window_params = [{transform_indices = @transform_0, window_bounds = array<i64: 1, 144, 256>}, {pipeline_mode = #tpu.pipeline_mode<synchronous>, transform_indices = @transform_1, window_bounds = array<i64: 3, 144>}, {pipeline_mode = #tpu.pipeline_mode<synchronous>, transform_indices = @transform_2, window_bounds = array<i64: 3, 1>}, {transform_indices = @transform_3, window_bounds = array<i64: 1, 3, 256>}, {transform_indices = @transform_4, window_bounds = array<i64: 1, 3, 256>}, {transform_indices = @transform_5, window_bounds = array<i64: 1, 3, 256>}, {transform_indices = @transform_6, window_bounds = array<i64: 1, 3, 256>}]} {
    %c0 = arith.constant 0 : index
    %c0_0 = arith.constant 0 : index
    %0 = vector.load %arg3[%c0, %c0_0] : memref<3x144xbf16, #tpu.memory_space<vmem>>, vector<3x144xbf16>
    %c0_1 = arith.constant 0 : index
    %c0_2 = arith.constant 0 : index
    %c0_3 = arith.constant 0 : index
    %1 = vector.load %arg2[%c0_1, %c0_2, %c0_3] : memref<1x144x256xbf16, #tpu.memory_space<vmem>>, vector<1x144x256xbf16>
    %2 = vector.shape_cast %1 : vector<1x144x256xbf16> to vector<144x256xbf16>
    %cst = arith.constant dense<0.000000e+00> : vector<3x256xf32>
    %3 = tpu.matmul %0, %2, %cst {dimension_numbers = #tpu.dot_dimension_numbers<[1], [0], [0], [1], [0, 0, 1, 1], [], []>} : vector<3x144xbf16>, vector<144x256xbf16>, vector<3x256xf32> -> vector<3x256xf32>
    %c0_4 = arith.constant 0 : index
    %c0_5 = arith.constant 0 : index
    %4 = vector.load %arg4[%c0_4, %c0_5] : memref<3x1xf32, #tpu.memory_space<vmem>>, vector<3x1xf32>
    %5 = vector.broadcast %4 : vector<3x1xf32> to vector<3x256xf32>
    %6 = arith.addf %3, %5 : vector<3x256xf32>
    %7 = arith.negf %6 : vector<3x256xf32>
    %8 = math.exp %7 : vector<3x256xf32>
    %cst_6 = arith.constant 1.000000e+00 : f32
    %9 = vector.broadcast %cst_6 : f32 to vector<3x256xf32>
    %10 = arith.addf %9, %8 : vector<3x256xf32>
    %11 = arith.divf %9, %10 : vector<3x256xf32>
    %c0_7 = arith.constant 0 : index
    %c0_8 = arith.constant 0 : index
    %c0_9 = arith.constant 0 : index
    %12 = vector.load %arg5[%c0_7, %c0_8, %c0_9] : memref<1x3x256xf32, #tpu.memory_space<vmem>>, vector<1x3x256xf32>
    %13 = vector.shape_cast %12 : vector<1x3x256xf32> to vector<3x256xf32>
    %14 = arith.subf %13, %11 : vector<3x256xf32>
    %c0_10 = arith.constant 0 : index
    %c0_11 = arith.constant 0 : index
    %c0_12 = arith.constant 0 : index
    %15 = vector.load %arg6[%c0_10, %c0_11, %c0_12] : memref<1x3x256xf32, #tpu.memory_space<vmem>>, vector<1x3x256xf32>
    %16 = vector.shape_cast %15 : vector<1x3x256xf32> to vector<3x256xf32>
    %17 = arith.addf %16, %14 : vector<3x256xf32>
    %c0_13 = arith.constant 0 : index
    %c0_14 = arith.constant 0 : index
    %c0_15 = arith.constant 0 : index
    %18 = vector.load %arg7[%c0_13, %c0_14, %c0_15] : memref<1x3x256xf32, #tpu.memory_space<vmem>>, vector<1x3x256xf32>
    %19 = vector.shape_cast %18 : vector<1x3x256xf32> to vector<3x256xf32>
    %20 = vector.shape_cast %17 : vector<3x256xf32> to vector<1x3x256xf32>
    tpu.vector_store %arg7[%c0_13, %c0_14, %c0_15], %20 {strides = array<i32>} : memref<1x3x256xf32, #tpu.memory_space<vmem>>, vector<1x3x256xf32>,
    %21 = math.absf %14 : vector<3x256xf32>
    %c0_16 = arith.constant 0 : index
    %c0_17 = arith.constant 0 : index
    %c0_18 = arith.constant 0 : index
    %22 = vector.load %arg8[%c0_16, %c0_17, %c0_18] : memref<1x3x256xf32, #tpu.memory_space<vmem>>, vector<1x3x256xf32>
    %23 = vector.shape_cast %22 : vector<1x3x256xf32> to vector<3x256xf32>
    %24 = vector.shape_cast %21 : vector<3x256xf32> to vector<1x3x256xf32>
    tpu.vector_store %arg8[%c0_16, %c0_17, %c0_18], %24 {strides = array<i32>} : memref<1x3x256xf32, #tpu.memory_space<vmem>>, vector<1x3x256xf32>,
    return
  }
  func.func @transform_0(%arg0: i32, %arg1: i32) -> (i32, i32, i32) {
    %c0_i32 = arith.constant 0 : i32
    %c0_i32_0 = arith.constant 0 : i32
    return %arg0, %c0_i32, %arg1 : i32, i32, i32
  }
  func.func @transform_1(%arg0: i32, %arg1: i32) -> (i32, i32) {
    %c0_i32 = arith.constant 0 : i32
    %c0_i32_0 = arith.constant 0 : i32
    %c0_i32_1 = arith.constant 0 : i32
    return %c0_i32, %c0_i32_0 : i32, i32
  }
  func.func @transform_2(%arg0: i32, %arg1: i32) -> (i32, i32) {
    %c0_i32 = arith.constant 0 : i32
    %c0_i32_0 = arith.constant 0 : i32
    %c0_i32_1 = arith.constant 0 : i32
    return %c0_i32, %c0_i32_0 : i32, i32
  }
  func.func @transform_3(%arg0: i32, %arg1: i32) -> (i32, i32, i32) {
    %c0_i32 = arith.constant 0 : i32
    %c0_i32_0 = arith.constant 0 : i32
    return %arg0, %c0_i32, %arg1 : i32, i32, i32
  }
  func.func @transform_4(%arg0: i32, %arg1: i32) -> (i32, i32, i32) {
    %c0_i32 = arith.constant 0 : i32
    %c0_i32_0 = arith.constant 0 : i32
    return %arg0, %c0_i32, %arg1 : i32, i32, i32
  }
  func.func @transform_5(%arg0: i32, %arg1: i32) -> (i32, i32, i32) {
    %c0_i32 = arith.constant 0 : i32
    %c0_i32_0 = arith.constant 0 : i32
    return %arg0, %c0_i32, %arg1 : i32, i32, i32
  }
  func.func @transform_6(%arg0: i32, %arg1: i32) -> (i32, i32, i32) {
    %c0_i32 = arith.constant 0 : i32
    %c0_i32_0 = arith.constant 0 : i32
    return %arg0, %c0_i32, %arg1 : i32, i32, i32
  }
}

</mosaic_0001>

<bundles_post_ra>
// kernel: sci_forward.33
= control target key start
LH: loop header
LB: loop body
LE: loop exit
PB: predicated region body
PF: predicated region fallthrough
CT: control target
= control target key end

     0   :  { %s486_s12 = smov 0   ;;  %s488_s13 = smov 0   ;;  %s529_s0 = inlined_call_operand.vmem [shape: bf16[2,27,256], index: 0, kind: input, shape index: {}]   ;;  %s530_s1 = inlined_call_operand.vmem [shape: bf16[3,27], index: 1, kind: input, shape index: {}]   ;;  %s531_s2 = inlined_call_operand.vmem [shape: f32[3,1], index: 2, kind: input, shape index: {}]   ;;  %s532_s3 = inlined_call_operand.vmem [shape: f32[2,3,256], index: 3, kind: output, shape index: {}]  }
   0x1   :  { %s490_s14 = smov 0  }
   0x2 LB: > { %s25_s15 = sadd.s32 1, %s458_s13  ;;  %p393_p0 = scmp.ge.s32.totalorder %s462_s14, 1  ;;  %s462_s14 = sphi %s490_s14, %s13_s14   ;;  %s458_s13 = sphi %s488_s13, %s534_s13   ;;  %s454_s12 = sphi %s486_s12, %s533_s12  }
   0x3   : > { %p27_p1 = scmp.ge.s32.totalorder %s25_s15, 2  ;;  %p158_p2 = scmp.lt.s32.totalorder %s462_s14, 3 }
   0x5   : > { %s536_s15 = smov (%p27_p1, %s25_s15), 0  ;;  %p159_p3 = pnand %p393_p0, %p158_p2 }
   0x6   : > { %p191_p4 = scmp.lt.s32.totalorder (!%p159_p3), %s454_s12, 1  ;;  %vm244_vm0 = vcmask (!%p159_p3), 1044480   ;;  %v464_v0 = vmov (!%p159_p3), 0   ;;  %v216_v1 = vld [vmem:[%s531_s2] sm:$0x7] (!%p159_p3)  ;;  %vm245_vm1 = vcmask (!%p159_p3), 1045504  }
   0x7   : > { %162 = sbr.rel (%p159_p3) target bundleno = 246 (0xf6), region = 32  ;;  %286 = vmatprep.mubr.bf16.mxu0 (!%p159_p3), %v464_v0  ;;  %433 = vset.pattern.permute.xlu0 (!%p159_p3), %v464_v0  ;;  %v465_v2 = vmov (!%p159_p3), 65535   ;;  %v211_v11 = vld [vmem:[%s530_s1] sm:$0x3] (!%p159_p3)  ;;  %vm240_vm2 = vcmask (!%p159_p3), 220160  }
   0x8   : > { %219 = vperm.xlu0 (!%p159_p3), %433, %v216_v1   ;;  %v246_v3 = vsel (!%p159_p3), %vm244_vm0, 4294967295, %v465_v2 }
   0x9   : > { %v247_v6 = vsel (!%p159_p3), %vm245_vm1, %v246_v3, 0 }
   0xe   : > { %s538_s12 = smov (!%p191_p4, %s454_s12), 1 }
   0xf   : > { %s405_s18 = sshll.u32 %s538_s12, 5  ;;  %s406_s24 = sshll.u32 %s538_s12, 3 }
  0x10   : > { %s198_s21 = scalar_lea.vmem %s529_s0, %s405_s18  ;;  %s208_s27 = scalar_lea.vmem %s532_s3, %s406_s24 }
  0x11   : > { %v434_v4 = vld [vmem:[%s198_s21 + $0x4] ss:$8 sps:$4 sm:$0xff]   ;;  %v436_v5 = vld [vmem:[%s198_s21] ss:$8 sps:$4 sm:$0xff]  }
  0x12   : > { %254 = vmatprep.subr.bf16.mxu0 %v434_v4  ;;  %v437_v7 = vld [vmem:[%s198_s21 + $0x14] ss:$8 sps:$4 sm:$0x3f]   ;;  %v439_v8 = vld [vmem:[%s198_s21 + $0x10] ss:$8 sps:$4 sm:$0x3f]  }
  0x13   : > { %255 = vmatpush1.bf16.msra.mxu0 %v436_v5  ;;  %v252_v9 = vand.u32 %v437_v7, %v247_v6  ;;  %v249_v10 = vand.u32 %v439_v8, %v247_v6 }
  0x15   : > { %256 = vmatprep.subr.bf16.mxu0 %v252_v9 }
  0x17   : > { %257 = vmatpush1.bf16.msra.mxu0 %v249_v10 }
  0x1a   : > { %402 = vmatmul.mubr.msk.bf16.vlgmr.msra.gmra.mrb[0].mxu0 %vm240_vm2, %v211_v11 }
  0x87   : > { %v220_v12 = vpop.permute.xlu0 %219 }
  0xed   : > { %v288_v13 = vpop.f32.mrb[0].mxu0 }
  0xee   : > { %v289_v14 = vadd.f32 %v288_v13, %v220_v12  ;;  %v290_v15 = vpop.f32.mrb[1].mxu0 }
  0xef   : > { %v291_v16 = vadd.f32 %v290_v15, %v220_v12  ;;  %v292_v17 = vpop.f32.mrb[2].mxu0 }
  0xf0   : > { %v295_v18 = vmax.f32 %v289_v14, 0.0  ;;  %v293_v19 = vpop.f32.mrb[3].mxu0 }
  0xf1   : > { %v296_v20 = vmax.f32 %v291_v16, 0.0 }
  0xf3   : > { %v299_v21 = vcombine.low %v295_v18, %v296_v20 }
  0xf5   : > { %301 = vst [vmem:[%s208_s27] sm:$0x77] %v299_v21 }
  0xf6 PF: > { %s13_s14 = sadd.s32 1, %s462_s14   ;;  %s533_s12 = smov %s458_s13 }
  0xf7   : > { %p10_p5 = scmp.ge.s32.totalorder %s13_s14, 4   ;;  %s534_s13 = smov %s536_s15 }
  0xf9   :  { %12 = sbr.rel (!%p10_p5) target bundleno = 2 (0x2), region = 62 }

// kernel: sci_forward.34
= control target key start
LH: loop header
LB: loop body
LE: loop exit
PB: predicated region body
PF: predicated region fallthrough
CT: control target
= control target key end

     0   :  { %s577_s15 = smov 0   ;;  %s579_s16 = smov 0   ;;  %s623_s0 = inlined_call_operand.vmem [shape: bf16[2,27,256], index: 0, kind: input, shape index: {}]   ;;  %s624_s1 = inlined_call_operand.vmem [shape: bf16[3,27], index: 1, kind: input, shape index: {}]   ;;  %s625_s2 = inlined_call_operand.vmem [shape: f32[3,1], index: 2, kind: input, shape index: {}]   ;;  %s626_s3 = inlined_call_operand.vmem [shape: f32[2,3,256], index: 3, kind: input, shape index: {}]   ;;  %s627_s4 = inlined_call_operand.vmem [shape: f32[2,3,256], index: 4, kind: output, shape index: {}]  }
   0x1   :  { %s581_s17 = smov 0  }
   0x2 LB: > { %s26_s18 = sadd.s32 1, %s544_s16  ;;  %p476_p0 = scmp.ge.s32.totalorder %s548_s17, 1  ;;  %s548_s17 = sphi %s581_s17, %s14_s17   ;;  %s544_s16 = sphi %s579_s16, %s629_s16   ;;  %s540_s15 = sphi %s577_s15, %s628_s15  }
   0x3   : > { %p28_p1 = scmp.ge.s32.totalorder %s26_s18, 2  ;;  %p200_p2 = scmp.lt.s32.totalorder %s548_s17, 3 }
   0x5   : > { %s631_s18 = smov (%p28_p1, %s26_s18), 0  ;;  %p201_p3 = pnand %p476_p0, %p200_p2 }
   0x6   : > { %p244_p4 = scmp.lt.s32.totalorder (!%p201_p3), %s540_s15, 1  ;;  %vm307_vm0 = vcmask (!%p201_p3), 1044480   ;;  %v550_v0 = vmov (!%p201_p3), 0   ;;  %v279_v1 = vld [vmem:[%s625_s2] sm:$0x7] (!%p201_p3)  ;;  %vm308_vm1 = vcmask (!%p201_p3), 1045504  }
   0x7   : > { %204 = sbr.rel (%p201_p3) target bundleno = 248 (0xf8), region = 36  ;;  %349 = vmatprep.mubr.bf16.mxu0 (!%p201_p3), %v550_v0  ;;  %519 = vset.pattern.permute.xlu0 (!%p201_p3), %v550_v0  ;;  %v551_v2 = vmov (!%p201_p3), 65535   ;;  %v274_v11 = vld [vmem:[%s624_s1] sm:$0x3] (!%p201_p3)  ;;  %vm303_vm2 = vcmask (!%p201_p3), 220160  }
   0x8   : > { %282 = vperm.xlu0 (!%p201_p3), %519, %v279_v1   ;;  %v309_v3 = vsel (!%p201_p3), %vm307_vm0, 4294967295, %v551_v2 }
   0x9   : > { %v310_v6 = vsel (!%p201_p3), %vm308_vm1, %v309_v3, 0 }
   0xe   : > { %s633_s15 = smov (!%p244_p4, %s540_s15), 1 }
   0xf   : > { %s490_s21 = sshll.u32 %s633_s15, 5  ;;  %s491_s27 = sshll.u32 %s633_s15, 3 }
  0x10   : > { %s251_s24 = scalar_lea.vmem %s623_s0, %s490_s21  ;;  %s261_s30 = scalar_lea.vmem %s626_s3, %s491_s27 }
  0x11   : > { %v520_v4 = vld [vmem:[%s251_s24 + $0x4] ss:$8 sps:$4 sm:$0xff]   ;;  %v522_v5 = vld [vmem:[%s251_s24] ss:$8 sps:$4 sm:$0xff]   ;;  %s271_s7 = scalar_lea.vmem %s627_s4, %s491_s27 }
  0x12   : > { %317 = vmatprep.subr.bf16.mxu0 %v520_v4  ;;  %v523_v7 = vld [vmem:[%s251_s24 + $0x14] ss:$8 sps:$4 sm:$0x3f]   ;;  %v525_v8 = vld [vmem:[%s251_s24 + $0x10] ss:$8 sps:$4 sm:$0x3f]  }
  0x13   : > { %318 = vmatpush1.bf16.msra.mxu0 %v522_v5  ;;  %v315_v9 = vand.u32 %v523_v7, %v310_v6  ;;  %v312_v10 = vand.u32 %v525_v8, %v310_v6  ;;  %v360_v21 = vld [vmem:[%s261_s30] sm:$0x77] }
  0x15   : > { %319 = vmatprep.subr.bf16.mxu0 %v315_v9 }
  0x17   : > { %320 = vmatpush1.bf16.msra.mxu0 %v312_v10 }
  0x1a   : > { %487 = vmatmul.mubr.msk.bf16.vlgmr.msra.gmra.mrb[0].mxu0 %vm303_vm2, %v274_v11 }
  0x87   : > { %v283_v12 = vpop.permute.xlu0 %282 }
  0xed   : > { %v351_v13 = vpop.f32.mrb[0].mxu0 }
  0xee   : > { %v352_v14 = vadd.f32 %v351_v13, %v283_v12  ;;  %v353_v15 = vpop.f32.mrb[1].mxu0 }
  0xef   : > { %v354_v16 = vadd.f32 %v353_v15, %v283_v12  ;;  %v355_v17 = vpop.f32.mrb[2].mxu0 }
  0xf0   : > { %v358_v18 = vmax.f32 %v352_v14, 0.0  ;;  %v356_v19 = vpop.f32.mrb[3].mxu0 }
  0xf1   : > { %v359_v20 = vmax.f32 %v354_v16, 0.0 }
  0xf3   : > { %v363_v22 = vcombine.low %v358_v18, %v359_v20 }
  0xf5   : > { %v365_v23 = vadd.f32 %v363_v22, %v360_v21 }
  0xf7   : > { %366 = vst [vmem:[%s271_s7] sm:$0x77] %v365_v23 }
  0xf8 PF: > { %s14_s17 = sadd.s32 1, %s548_s17   ;;  %s628_s15 = smov %s544_s16 }
  0xf9   : > { %p11_p5 = scmp.ge.s32.totalorder %s14_s17, 4   ;;  %s629_s16 = smov %s631_s18 }
  0xfb   :  { %13 = sbr.rel (!%p11_p5) target bundleno = 2 (0x2), region = 69 }

// kernel: sci_forward.35
= control target key start
LH: loop header
LB: loop body
LE: loop exit
PB: predicated region body
PF: predicated region fallthrough
CT: control target
= control target key end

     0   :  { %s819_s21 = smov 0   ;;  %s821_s22 = smov 0   ;;  %s877_s0 = inlined_call_operand.vmem [shape: bf16[2,27,256], index: 0, kind: input, shape index: {}]   ;;  %s878_s1 = inlined_call_operand.vmem [shape: bf16[3,27], index: 1, kind: input, shape index: {}]   ;;  %s879_s2 = inlined_call_operand.vmem [shape: f32[3,1], index: 2, kind: input, shape index: {}]   ;;  %s880_s3 = inlined_call_operand.vmem [shape: f32[2,3,256], index: 3, kind: input, shape index: {}, may-alias: {3,4}]   ;;  %s881_s4 = inlined_call_operand.vmem [shape: f32[2,3,256], index: 4, kind: input, shape index: {}, may-alias: {3,4}]   ;;  %s882_s5 = inlined_call_operand.vmem [shape: f32[2,3,256], index: 5, kind: output, shape index: {0}]   ;;  %s883_s6 = inlined_call_operand.vmem [shape: f32[2,3,256], index: 6, kind: output, shape index: {1}]  }
   0x1   :  { %s823_s23 = smov 0  }
   0x2 LB: > { %s29_s24 = sadd.s32 1, %s776_s22  ;;  %p687_p0 = scmp.ge.s32.totalorder %s780_s23, 1  ;;  %s780_s23 = sphi %s823_s23, %s17_s23   ;;  %s776_s22 = sphi %s821_s22, %s885_s22   ;;  %s772_s21 = sphi %s819_s21, %s884_s21  }
   0x3   : > { %p31_p1 = scmp.ge.s32.totalorder %s29_s24, 2  ;;  %p272_p2 = scmp.lt.s32.totalorder %s780_s23, 3 }
   0x5   : > { %s887_s24 = smov (%p31_p1, %s29_s24), 0  ;;  %p273_p3 = pnand %p687_p0, %p272_p2 }
   0x6   : > { %p338_p4 = scmp.lt.s32.totalorder (!%p273_p3), %s772_s21, 1  ;;  %vm421_vm0 = vcmask (!%p273_p3), 1044480   ;;  %v782_v0 = vmov (!%p273_p3), 0   ;;  %v393_v1 = vld [vmem:[%s879_s2] sm:$0x7] (!%p273_p3)  ;;  %vm422_vm1 = vcmask (!%p273_p3), 1045504  }
   0x7   : > { %276 = sbr.rel (%p273_p3) target bundleno = 293 (0x125), region = 40  ;;  %463 = vmatprep.mubr.bf16.mxu0 (!%p273_p3), %v782_v0  ;;  %738 = vset.pattern.permute.xlu0 (!%p273_p3), %v782_v0  ;;  %v783_v2 = vmov (!%p273_p3), 65535   ;;  %v388_v11 = vld [vmem:[%s878_s1] sm:$0x3] (!%p273_p3)  ;;  %vm417_vm2 = vcmask (!%p273_p3), 220160  }
   0x8   : > { %396 = vperm.xlu0 (!%p273_p3), %738, %v393_v1   ;;  %v423_v3 = vsel (!%p273_p3), %vm421_vm0, 4294967295, %v783_v2 }
   0x9   : > { %v424_v6 = vsel (!%p273_p3), %vm422_vm1, %v423_v3, 0 }
   0xe   : > { %s889_s21 = smov (!%p338_p4, %s772_s21), 1 }
   0xf   : > { %s707_s27 = sshll.u32 %s889_s21, 5  ;;  %s850_s9 = sshll.u32 %s889_s21, 3 }
  0x10   : > { %s345_s30 = scalar_lea.vmem %s877_s0, %s707_s27  ;;  %s355_s12 = scalar_lea.vmem %s880_s3, %s850_s9 }
  0x11   : > { %v739_v4 = vld [vmem:[%s345_s30 + $0x4] ss:$8 sps:$4 sm:$0xff]   ;;  %v742_v5 = vld [vmem:[%s345_s30] ss:$8 sps:$4 sm:$0xff]   ;;  %s375_s15 = scalar_lea.vmem %s882_s5, %s850_s9  ;;  %s365_s18 = scalar_lea.vmem %s881_s4, %s850_s9 }
  0x12   : > { %431 = vmatprep.subr.bf16.mxu0 %v739_v4  ;;  %v743_v7 = vld [vmem:[%s345_s30 + $0x14] ss:$8 sps:$4 sm:$0x3f]   ;;  %v745_v8 = vld [vmem:[%s345_s30 + $0x10] ss:$8 sps:$4 sm:$0x3f]   ;;  %s385_s21 = scalar_lea.vmem %s883_s6, %s850_s9 }
  0x13   : > { %432 = vmatpush1.bf16.msra.mxu0 %v742_v5  ;;  %v429_v9 = vand.u32 %v743_v7, %v424_v6  ;;  %v426_v10 = vand.u32 %v745_v8, %v424_v6  ;;  %v484_v25 = vld [vmem:[%s355_s12] sm:$0x77] }
  0x14   : > { %v486_v26 = vcombine.high %v484_v25, %v484_v25  ;;  %v494_v38 = vld [vmem:[%s365_s18] sm:$0x77] }
  0x15   : > { %433 = vmatprep.subr.bf16.mxu0 %v429_v9 }
  0x17   : > { %434 = vmatpush1.bf16.msra.mxu0 %v426_v10 }
  0x1a   : > { %702 = vmatmul.mubr.msk.bf16.vlgmr.msra.gmra.mrb[0].mxu0 %vm417_vm2, %v388_v11 }
  0x87   : > { %v397_v12 = vpop.permute.xlu0 %396 }
  0xed   : > { %v465_v13 = vpop.f32.mrb[0].mxu0 }
  0xee   : > { %v466_v14 = vadd.f32 %v465_v13, %v397_v12  ;;  %v467_v15 = vpop.f32.mrb[1].mxu0 }
  0xef   : > { %v468_v16 = vadd.f32 %v467_v15, %v397_v12  ;;  %v469_v17 = vpop.f32.mrb[2].mxu0 }
  0xf0   : > { %v703_v18 = vmul.f32 -1.442695, %v466_v14  ;;  %v470_v19 = vpop.f32.mrb[3].mxu0 }
  0xf1   : > { %v704_v20 = vmul.f32 -1.442695, %v468_v16 }
  0xf2   : > { %746 = vpow2.f32 %v703_v18 }
  0xf3   : > { %748 = vpow2.f32 %v704_v20 }
  0xfc   : > { %v747_v21 = vpop.eup %746 }
  0xfd   : > { %v749_v22 = vpop.eup %748  ;;  %v478_v23 = vadd.f32 1.0, %v747_v21 }
  0xfe   : > { %v479_v24 = vadd.f32 1.0, %v749_v22 }
  0xff   : > { %750 = vrcp.f32 %v478_v23 }
 0x100   : > { %752 = vrcp.f32 %v479_v24 }
 0x109   : > { %v751_v27 = vpop.eup %750 }
 0x10a   : > { %v753_v28 = vpop.eup %752  ;;  %v488_v29 = vadd.f32 %v751_v27, %v484_v25 }
 0x10b   : > { %v489_v30 = vadd.f32 %v753_v28, %v486_v26 }
 0x10c   : > { %v490_v31 = vmax.f32 %v488_v29, 0.0001 }
 0x10d   : > { %v491_v32 = vmax.f32 %v489_v30, 0.0001 }
 0x10e   : > { %v492_v33 = vmin.f32 %v490_v31, 1.0 }
 0x10f   : > { %v493_v34 = vmin.f32 %v491_v32, 1.0 }
 0x110   : > { %754 = vrcp.f32 %v492_v33 }
 0x111   : > { %756 = vrcp.f32 %v493_v34  ;;  %v506_v35 = vcombine.low %v492_v33, %v493_v34 }
 0x113   : > { %508 = vst [vmem:[%s375_s15] sm:$0x77] %v506_v35 }
 0x11a   : > { %v755_v36 = vpop.eup %754 }
 0x11b   : > { %v757_v37 = vpop.eup %756 }
 0x11c   : > { %v499_v39 = vcombine.low %v755_v36, %v757_v37 }
 0x11e   : > { %v501_v40 = vmul.f32 %v499_v39, %v494_v38 }
 0x120   : > { %v502_v41 = vmax.f32 %v501_v40, 0.0 }
 0x122   : > { %v503_v42 = vmin.f32 %v502_v41, 1.0 }
 0x124   : > { %509 = vst [vmem:[%s385_s21] sm:$0x77] %v503_v42 }
 0x125 PF: > { %s17_s23 = sadd.s32 1, %s780_s23   ;;  %s884_s21 = smov %s776_s22 }
 0x126   : > { %p14_p5 = scmp.ge.s32.totalorder %s17_s23, 4   ;;  %s885_s22 = smov %s887_s24 }
 0x128   :  { %16 = sbr.rel (!%p14_p5) target bundleno = 2 (0x2), region = 88 }

// kernel: sci_forward.36
= control target key start
LH: loop header
LB: loop body
LE: loop exit
PB: predicated region body
PF: predicated region fallthrough
CT: control target
= control target key end

     0   :  { %s503_s12 = smov 0   ;;  %s505_s13 = smov 0   ;;  %s548_s0 = inlined_call_operand.vmem [shape: bf16[2,27,256], index: 0, kind: input, shape index: {}]   ;;  %s549_s1 = inlined_call_operand.vmem [shape: bf16[16,27], index: 1, kind: input, shape index: {}]   ;;  %s550_s2 = inlined_call_operand.vmem [shape: f32[16,1], index: 2, kind: input, shape index: {}]   ;;  %s551_s3 = inlined_call_operand.vmem [shape: f32[2,16,256], index: 3, kind: output, shape index: {}]  }
   0x1   :  { %s507_s14 = smov 0  }
   0x2 LB: > { %s25_s15 = sadd.s32 1, %s475_s13  ;;  %p408_p0 = scmp.ge.s32.totalorder %s479_s14, 1  ;;  %s479_s14 = sphi %s507_s14, %s13_s14   ;;  %s475_s13 = sphi %s505_s13, %s553_s13   ;;  %s471_s12 = sphi %s503_s12, %s552_s12  }
   0x3   : > { %p27_p1 = scmp.ge.s32.totalorder %s25_s15, 2  ;;  %p158_p2 = scmp.lt.s32.totalorder %s479_s14, 3 }
   0x5   : > { %s555_s15 = smov (%p27_p1, %s25_s15), 0  ;;  %p159_p3 = pnand %p408_p0, %p158_p2 }
   0x6   : > { %p191_p4 = scmp.lt.s32.totalorder (!%p159_p3), %s471_s12, 1  ;;  %vm256_vm0 = vcmask (!%p159_p3), 1044480   ;;  %v481_v0 = vmov (!%p159_p3), 0   ;;  %v217_v1 = vld [vmem:[%s550_s2] sm:$0xff] (!%p159_p3)  ;;  %vm257_vm1 = vcmask (!%p159_p3), 1045504   ;;  %v482_v2 = vmov (!%p159_p3), 65535  }
   0x7   : > { %162 = sbr.rel (%p159_p3) target bundleno = 246 (0xf6), region = 32  ;;  %298 = vmatprep.mubr.bf16.mxu0 (!%p159_p3), %v481_v0  ;;  %449 = vset.pattern.permute.xlu0 (!%p159_p3), %v481_v0  ;;  %v258_v3 = vsel (!%p159_p3), %vm256_vm0, 4294967295, %v482_v2  ;;  %v218_v4 = vld [vmem:[%s550_s2 + $0x8] sm:$0xff] (!%p159_p3)  ;;  %v456_v12 = vld [vmem:[%s549_s1] sm:$0xff] (!%p159_p3)   ;;  %vm252_vm2 = vcmask (!%p159_p3), 220160  }
   0x8   : > { %221 = vperm.xlu0 (!%p159_p3), %449, %v217_v1   ;;  %v259_v7 = vsel (!%p159_p3), %vm257_vm1, %v258_v3, 0 }
   0xc   : > { %226 = vperm.xlu0 (!%p159_p3), %449, %v218_v4  }
   0xe   : > { %s557_s12 = smov (!%p191_p4, %s471_s12), 1 }
   0xf   : > { %s421_s18 = sshll.u32 %s557_s12, 5 }
  0x10   : > { %s198_s23 = scalar_lea.vmem %s548_s0, %s421_s18  ;;  %s208_s28 = scalar_lea.vmem %s551_s3, %s421_s18 }
  0x11   : > { %v450_v5 = vld [vmem:[%s198_s23 + $0x4] ss:$8 sps:$4 sm:$0xff]   ;;  %v452_v6 = vld [vmem:[%s198_s23] ss:$8 sps:$4 sm:$0xff]  }
  0x12   : > { %266 = vmatprep.subr.bf16.mxu0 %v450_v5  ;;  %v453_v8 = vld [vmem:[%s198_s23 + $0x14] ss:$8 sps:$4 sm:$0x3f]   ;;  %v455_v9 = vld [vmem:[%s198_s23 + $0x10] ss:$8 sps:$4 sm:$0x3f]  }
  0x13   : > { %267 = vmatpush1.bf16.msra.mxu0 %v452_v6  ;;  %v264_v10 = vand.u32 %v453_v8, %v259_v7  ;;  %v261_v11 = vand.u32 %v455_v9, %v259_v7 }
  0x15   : > { %268 = vmatprep.subr.bf16.mxu0 %v264_v10 }
  0x17   : > { %269 = vmatpush1.bf16.msra.mxu0 %v261_v11 }
  0x1a   : > { %418 = vmatmul.mubr.msk.bf16.vlgmr.msra.gmra.mrb[0].mxu0 %vm252_vm2, %v456_v12 }
  0x87   : > { %v222_v13 = vpop.permute.xlu0 %221 }
  0x8b   : > { %v227_v17 = vpop.permute.xlu0 %226 }
  0xed   : > { %v300_v14 = vpop.f32.mrb[0].mxu0 }
  0xee   : > { %v301_v15 = vadd.f32 %v300_v14, %v222_v13  ;;  %v302_v16 = vpop.f32.mrb[1].mxu0 }
  0xef   : > { %v303_v18 = vadd.f32 %v302_v16, %v222_v13  ;;  %v304_v19 = vpop.f32.mrb[2].mxu0 }
  0xf0   : > { %v309_v20 = vmax.f32 %v301_v15, 0.0  ;;  %v305_v21 = vadd.f32 %v304_v19, %v227_v17  ;;  %v306_v22 = vpop.f32.mrb[3].mxu0 }
  0xf1   : > { %v310_v23 = vmax.f32 %v303_v18, 0.0  ;;  %v307_v24 = vadd.f32 %v306_v22, %v227_v17 }
  0xf2   : > { %313 = vst [vmem:[%s208_s28] sm:$0xff] %v309_v20  ;;  %v311_v25 = vmax.f32 %v305_v21, 0.0 }
  0xf3   : > { %314 = vst [vmem:[%s208_s28 + $0x8] sm:$0xff] %v310_v23  ;;  %v312_v26 = vmax.f32 %v307_v24, 0.0 }
  0xf4   : > { %315 = vst [vmem:[%s208_s28 + $0x10] sm:$0xff] %v311_v25 }
  0xf5   : > { %316 = vst [vmem:[%s208_s28 + $0x18] sm:$0xff] %v312_v26 }
  0xf6 PF: > { %s13_s14 = sadd.s32 1, %s479_s14   ;;  %s552_s12 = smov %s475_s13 }
  0xf7   : > { %p10_p5 = scmp.ge.s32.totalorder %s13_s14, 4   ;;  %s553_s13 = smov %s555_s15 }
  0xf9   :  { %12 = sbr.rel (!%p10_p5) target bundleno = 2 (0x2), region = 62 }

// kernel: sci_forward.37
= control target key start
LH: loop header
LB: loop body
LE: loop exit
PB: predicated region body
PF: predicated region fallthrough
CT: control target
= control target key end

     0   :  { %s618_s12 = smov 0   ;;  %s620_s13 = smov 0   ;;  %s687_s0 = inlined_call_operand.vmem [shape: bf16[2,144,256], index: 0, kind: input, shape index: {}]   ;;  %s688_s1 = inlined_call_operand.vmem [shape: bf16[16,144], index: 1, kind: input, shape index: {}]   ;;  %s689_s2 = inlined_call_operand.vmem [shape: f32[16,1], index: 2, kind: input, shape index: {}]   ;;  %s690_s3 = inlined_call_operand.vmem [shape: f32[2,16,256], index: 3, kind: output, shape index: {}]  }
   0x1   :  { %s622_s14 = smov 0  }
   0x2 LB: > { %s25_s15 = sadd.s32 1, %s591_s13  ;;  %p488_p0 = scmp.ge.s32.totalorder %s595_s14, 1  ;;  %s595_s14 = sphi %s622_s14, %s13_s14   ;;  %s591_s13 = sphi %s620_s13, %s692_s13   ;;  %s587_s12 = sphi %s618_s12, %s691_s12  }
   0x3   : > { %p27_p1 = scmp.ge.s32.totalorder %s25_s15, 2  ;;  %p158_p2 = scmp.lt.s32.totalorder %s595_s14, 3 }
   0x5   : > { %s694_s15 = smov (%p27_p1, %s25_s15), 0  ;;  %p159_p3 = pnand %p488_p0, %p158_p2 }
   0x6   : > { %p191_p4 = scmp.lt.s32.totalorder (!%p159_p3), %s587_s12, 1  ;;  %vm342_vm0 = vcmask (!%p159_p3), 130048   ;;  %v572_v0 = vld [vmem:[%s688_s1 + $0x4] ss:$8 sps:$4 sm:$0xff] (!%p159_p3)   ;;  %v597_v2 = vmov (!%p159_p3), 0  }
   0x7   : > { %162 = sbr.rel (%p159_p3) target bundleno = 275 (0x113), region = 32  ;;  %v231_v1 = vld [vmem:[%s689_s2] sm:$0xff] (!%p159_p3)  ;;  %542 = vset.pattern.permute.xlu0 (!%p159_p3), %v597_v2  ;;  %512 = vmatprep.mubr.msk.bf16.mxu0 (!%p159_p3), %vm342_vm0, %v572_v0  ;;  %v232_v3 = vld [vmem:[%s689_s2 + $0x8] sm:$0xff] (!%p159_p3) }
   0x8   : > { %235 = vperm.xlu0 (!%p159_p3), %542, %v231_v1   ;;  %v570_v22 = vld [vmem:[%s688_s1] ss:$8 sps:$4 sm:$0xff] (!%p159_p3)  }
   0xc   : > { %240 = vperm.xlu0 (!%p159_p3), %542, %v232_v3  }
   0xe   : > { %s696_s12 = smov (!%p191_p4, %s587_s12), 1 }
   0xf   : > { %s516_s20 = smul.u32 144, %s696_s12  ;;  %s515_s28 = sshll.u32 %s696_s12, 5 }
  0x10   : > { %s208_s4 = scalar_lea.vmem %s690_s3, %s515_s28 }
  0x11   : > { %s651_s25 = scalar_lea.vmem %s687_s0, %s516_s20 }
  0x12   : > { %v543_v4 = vld [vmem:[%s651_s25 + $0x4] ss:$8 sps:$4 sm:$0xff]   ;;  %v545_v5 = vld [vmem:[%s651_s25] ss:$8 sps:$4 sm:$0xff]   ;;  %v546_v6 = vld [vmem:[%s651_s25 + $0x14] ss:$8 sps:$4 sm:$0xff]  }
  0x13   : > { %346 = vmatprep.subr.bf16.mxu0 %v543_v4  ;;  %v548_v7 = vld [vmem:[%s651_s25 + $0x10] ss:$8 sps:$4 sm:$0xff]   ;;  %v549_v8 = vld [vmem:[%s651_s25 + $0x24] ss:$8 sps:$4 sm:$0xff]   ;;  %v551_v9 = vld [vmem:[%s651_s25 + $0x20] ss:$8 sps:$4 sm:$0xff]  }
  0x14   : > { %347 = vmatpush1.bf16.msra.mxu0 %v545_v5  ;;  %v552_v10 = vld [vmem:[%s651_s25 + $0x34] ss:$8 sps:$4 sm:$0xff]   ;;  %v554_v11 = vld [vmem:[%s651_s25 + $0x30] ss:$8 sps:$4 sm:$0xff]   ;;  %v555_v12 = vld [vmem:[%s651_s25 + $0x44] ss:$8 sps:$4 sm:$0xff]  }
  0x15   : > { %348 = vmatprep.subr.bf16.mxu0 %v546_v6  ;;  %v557_v13 = vld [vmem:[%s651_s25 + $0x40] ss:$8 sps:$4 sm:$0xff]   ;;  %v558_v14 = vld [vmem:[%s651_s25 + $0x54] ss:$8 sps:$4 sm:$0xff]   ;;  %v560_v15 = vld [vmem:[%s651_s25 + $0x50] ss:$8 sps:$4 sm:$0xff]  }
  0x16   : > { %v561_v16 = vld [vmem:[%s651_s25 + $0x64] ss:$8 sps:$4 sm:$0xff]   ;;  %v563_v17 = vld [vmem:[%s651_s25 + $0x60] ss:$8 sps:$4 sm:$0xff]   ;;  %v564_v18 = vld [vmem:[%s651_s25 + $0x74] ss:$8 sps:$4 sm:$0xff]  }
  0x17   : > { %v566_v19 = vld [vmem:[%s651_s25 + $0x70] ss:$8 sps:$4 sm:$0xff]   ;;  %v567_v20 = vld [vmem:[%s651_s25 + $0x84] ss:$8 sps:$4 sm:$0xff]   ;;  %v569_v21 = vld [vmem:[%s651_s25 + $0x80] ss:$8 sps:$4 sm:$0xff]  }
  0x18   : > { %349 = vmatpush1.bf16.msra.mxu0 %v548_v7 }
  0x19   : > { %350 = vmatprep.subr.bf16.mxu0 %v549_v8 }
  0x1c   : > { %351 = vmatpush1.bf16.msra.mxu0 %v551_v9 }
  0x1d   : > { %352 = vmatprep.subr.bf16.mxu0 %v552_v10 }
  0x20   : > { %353 = vmatpush1.bf16.msra.mxu0 %v554_v11 }
  0x21   : > { %354 = vmatprep.subr.bf16.mxu0 %v555_v12 }
  0x24   : > { %355 = vmatpush1.bf16.msra.mxu0 %v557_v13 }
  0x25   : > { %356 = vmatprep.subr.bf16.mxu0 %v558_v14 }
  0x28   : > { %357 = vmatpush1.bf16.msra.mxu0 %v560_v15 }
  0x29   : > { %358 = vmatprep.subr.bf16.mxu0 %v561_v16 }
  0x2c   : > { %359 = vmatpush1.bf16.msra.mxu0 %v563_v17 }
  0x2d   : > { %360 = vmatprep.subr.bf16.mxu0 %v564_v18 }
  0x30   : > { %361 = vmatpush1.bf16.msra.mxu0 %v566_v19 }
  0x31   : > { %362 = vmatprep.subr.bf16.mxu0 %v567_v20 }
  0x34   : > { %363 = vmatpush1.bf16.msra.mxu0 %v569_v21 }
  0x37   : > { %379 = vmatmul.mubr.bf16.vlgmr.msra.gmra.mrb[0].mxu0 %v570_v22 }
  0x87   : > { %v236_v23 = vpop.permute.xlu0 %235 }
  0x8b   : > { %v241_v27 = vpop.permute.xlu0 %240 }
 0x10a   : > { %v380_v24 = vpop.f32.mrb[0].mxu0 }
 0x10b   : > { %v381_v25 = vadd.f32 %v380_v24, %v236_v23  ;;  %v382_v26 = vpop.f32.mrb[1].mxu0 }
 0x10c   : > { %v383_v28 = vadd.f32 %v382_v26, %v236_v23  ;;  %v384_v29 = vpop.f32.mrb[2].mxu0 }
 0x10d   : > { %v389_v30 = vmax.f32 %v381_v25, 0.0  ;;  %v385_v31 = vadd.f32 %v384_v29, %v241_v27  ;;  %v386_v32 = vpop.f32.mrb[3].mxu0 }
 0x10e   : > { %v390_v33 = vmax.f32 %v383_v28, 0.0  ;;  %v387_v34 = vadd.f32 %v386_v32, %v241_v27 }
 0x10f   : > { %393 = vst [vmem:[%s208_s4] sm:$0xff] %v389_v30  ;;  %v391_v35 = vmax.f32 %v385_v31, 0.0 }
 0x110   : > { %394 = vst [vmem:[%s208_s4 + $0x8] sm:$0xff] %v390_v33  ;;  %v392_v36 = vmax.f32 %v387_v34, 0.0 }
 0x111   : > { %395 = vst [vmem:[%s208_s4 + $0x10] sm:$0xff] %v391_v35 }
 0x112   : > { %396 = vst [vmem:[%s208_s4 + $0x18] sm:$0xff] %v392_v36 }
 0x113 PF: > { %s13_s14 = sadd.s32 1, %s595_s14   ;;  %s691_s12 = smov %s591_s13 }
 0x114   : > { %p10_p5 = scmp.ge.s32.totalorder %s13_s14, 4   ;;  %s692_s13 = smov %s694_s15 }
 0x116   :  { %12 = sbr.rel (!%p10_p5) target bundleno = 2 (0x2), region = 62 }

// kernel: sci_forward.38
= control target key start
LH: loop header
LB: loop body
LE: loop exit
PB: predicated region body
PF: predicated region fallthrough
CT: control target
= control target key end

     0   :  { %s715_s15 = smov 0   ;;  %s717_s16 = smov 0   ;;  %s787_s0 = inlined_call_operand.vmem [shape: bf16[2,144,256], index: 0, kind: input, shape index: {}]   ;;  %s788_s1 = inlined_call_operand.vmem [shape: bf16[16,144], index: 1, kind: input, shape index: {}]   ;;  %s789_s2 = inlined_call_operand.vmem [shape: f32[16,1], index: 2, kind: input, shape index: {}]   ;;  %s790_s3 = inlined_call_operand.vmem [shape: f32[2,16,256], index: 3, kind: input, shape index: {}]   ;;  %s791_s4 = inlined_call_operand.vmem [shape: f32[2,16,256], index: 4, kind: output, shape index: {}]  }
   0x1   :  { %s719_s17 = smov 0  }
   0x2 LB: > { %s26_s18 = sadd.s32 1, %s683_s16  ;;  %p577_p0 = scmp.ge.s32.totalorder %s687_s17, 1  ;;  %s687_s17 = sphi %s719_s17, %s14_s17   ;;  %s683_s16 = sphi %s717_s16, %s793_s16   ;;  %s679_s15 = sphi %s715_s15, %s792_s15  }
   0x3   : > { %p28_p1 = scmp.ge.s32.totalorder %s26_s18, 2  ;;  %p200_p2 = scmp.lt.s32.totalorder %s687_s17, 3 }
   0x5   : > { %s795_s18 = smov (%p28_p1, %s26_s18), 0  ;;  %p201_p3 = pnand %p577_p0, %p200_p2 }
   0x6   : > { %p244_p4 = scmp.lt.s32.totalorder (!%p201_p3), %s679_s15, 1  ;;  %vm405_vm0 = vcmask (!%p201_p3), 130048   ;;  %v664_v0 = vld [vmem:[%s788_s1 + $0x4] ss:$8 sps:$4 sm:$0xff] (!%p201_p3)   ;;  %v689_v2 = vmov (!%p201_p3), 0  }
   0x7   : > { %204 = sbr.rel (%p201_p3) target bundleno = 277 (0x115), region = 36  ;;  %v294_v1 = vld [vmem:[%s789_s2] sm:$0xff] (!%p201_p3)  ;;  %634 = vset.pattern.permute.xlu0 (!%p201_p3), %v689_v2  ;;  %603 = vmatprep.mubr.msk.bf16.mxu0 (!%p201_p3), %vm405_vm0, %v664_v0  ;;  %v295_v3 = vld [vmem:[%s789_s2 + $0x8] sm:$0xff] (!%p201_p3) }
   0x8   : > { %298 = vperm.xlu0 (!%p201_p3), %634, %v294_v1   ;;  %v662_v22 = vld [vmem:[%s788_s1] ss:$8 sps:$4 sm:$0xff] (!%p201_p3)  }
   0xc   : > { %303 = vperm.xlu0 (!%p201_p3), %634, %v295_v3  }
   0xe   : > { %s797_s15 = smov (!%p244_p4, %s679_s15), 1 }
   0xf   : > { %s608_s23 = smul.u32 144, %s797_s15  ;;  %s606_s5 = sshll.u32 %s797_s15, 5 }
  0x10   : > { %s261_s8 = scalar_lea.vmem %s790_s3, %s606_s5  ;;  %s271_s11 = scalar_lea.vmem %s791_s4, %s606_s5 }
  0x11   : > { %s748_s28 = scalar_lea.vmem %s787_s0, %s608_s23  ;;  %v456_v28 = vld [vmem:[%s261_s8] sm:$0xff]  ;;  %v457_v32 = vld [vmem:[%s261_s8 + $0x8] sm:$0xff]  ;;  %v458_v36 = vld [vmem:[%s261_s8 + $0x10] sm:$0xff] }
  0x12   : > { %v635_v4 = vld [vmem:[%s748_s28 + $0x4] ss:$8 sps:$4 sm:$0xff]   ;;  %v637_v5 = vld [vmem:[%s748_s28] ss:$8 sps:$4 sm:$0xff]   ;;  %v638_v6 = vld [vmem:[%s748_s28 + $0x14] ss:$8 sps:$4 sm:$0xff]  }
  0x13   : > { %409 = vmatprep.subr.bf16.mxu0 %v635_v4  ;;  %v640_v7 = vld [vmem:[%s748_s28 + $0x10] ss:$8 sps:$4 sm:$0xff]   ;;  %v641_v8 = vld [vmem:[%s748_s28 + $0x24] ss:$8 sps:$4 sm:$0xff]   ;;  %v643_v9 = vld [vmem:[%s748_s28 + $0x20] ss:$8 sps:$4 sm:$0xff]  }
  0x14   : > { %410 = vmatpush1.bf16.msra.mxu0 %v637_v5  ;;  %v644_v10 = vld [vmem:[%s748_s28 + $0x34] ss:$8 sps:$4 sm:$0xff]   ;;  %v646_v11 = vld [vmem:[%s748_s28 + $0x30] ss:$8 sps:$4 sm:$0xff]   ;;  %v647_v12 = vld [vmem:[%s748_s28 + $0x44] ss:$8 sps:$4 sm:$0xff]  }
  0x15   : > { %411 = vmatprep.subr.bf16.mxu0 %v638_v6  ;;  %v649_v13 = vld [vmem:[%s748_s28 + $0x40] ss:$8 sps:$4 sm:$0xff]   ;;  %v650_v14 = vld [vmem:[%s748_s28 + $0x54] ss:$8 sps:$4 sm:$0xff]   ;;  %v652_v15 = vld [vmem:[%s748_s28 + $0x50] ss:$8 sps:$4 sm:$0xff]  }
  0x16   : > { %v653_v16 = vld [vmem:[%s748_s28 + $0x64] ss:$8 sps:$4 sm:$0xff]   ;;  %v655_v17 = vld [vmem:[%s748_s28 + $0x60] ss:$8 sps:$4 sm:$0xff]   ;;  %v656_v18 = vld [vmem:[%s748_s28 + $0x74] ss:$8 sps:$4 sm:$0xff]  }
  0x17   : > { %v658_v19 = vld [vmem:[%s748_s28 + $0x70] ss:$8 sps:$4 sm:$0xff]   ;;  %v659_v20 = vld [vmem:[%s748_s28 + $0x84] ss:$8 sps:$4 sm:$0xff]   ;;  %v661_v21 = vld [vmem:[%s748_s28 + $0x80] ss:$8 sps:$4 sm:$0xff]  }
  0x18   : > { %412 = vmatpush1.bf16.msra.mxu0 %v640_v7  ;;  %v459_v40 = vld [vmem:[%s261_s8 + $0x18] sm:$0xff] }
  0x19   : > { %413 = vmatprep.subr.bf16.mxu0 %v641_v8 }
  0x1c   : > { %414 = vmatpush1.bf16.msra.mxu0 %v643_v9 }
  0x1d   : > { %415 = vmatprep.subr.bf16.mxu0 %v644_v10 }
  0x20   : > { %416 = vmatpush1.bf16.msra.mxu0 %v646_v11 }
  0x21   : > { %417 = vmatprep.subr.bf16.mxu0 %v647_v12 }
  0x24   : > { %418 = vmatpush1.bf16.msra.mxu0 %v649_v13 }
  0x25   : > { %419 = vmatprep.subr.bf16.mxu0 %v650_v14 }
  0x28   : > { %420 = vmatpush1.bf16.msra.mxu0 %v652_v15 }
  0x29   : > { %421 = vmatprep.subr.bf16.mxu0 %v653_v16 }
  0x2c   : > { %422 = vmatpush1.bf16.msra.mxu0 %v655_v17 }
  0x2d   : > { %423 = vmatprep.subr.bf16.mxu0 %v656_v18 }
  0x30   : > { %424 = vmatpush1.bf16.msra.mxu0 %v658_v19 }
  0x31   : > { %425 = vmatprep.subr.bf16.mxu0 %v659_v20 }
  0x34   : > { %426 = vmatpush1.bf16.msra.mxu0 %v661_v21 }
  0x37   : > { %442 = vmatmul.mubr.bf16.vlgmr.msra.gmra.mrb[0].mxu0 %v662_v22 }
  0x87   : > { %v299_v23 = vpop.permute.xlu0 %298 }
  0x8b   : > { %v304_v27 = vpop.permute.xlu0 %303 }
 0x10a   : > { %v443_v24 = vpop.f32.mrb[0].mxu0 }
 0x10b   : > { %v444_v25 = vadd.f32 %v443_v24, %v299_v23  ;;  %v445_v26 = vpop.f32.mrb[1].mxu0 }
 0x10c   : > { %v446_v29 = vadd.f32 %v445_v26, %v299_v23  ;;  %v447_v30 = vpop.f32.mrb[2].mxu0 }
 0x10d   : > { %v452_v31 = vmax.f32 %v444_v25, 0.0  ;;  %v448_v33 = vadd.f32 %v447_v30, %v304_v27  ;;  %v449_v34 = vpop.f32.mrb[3].mxu0 }
 0x10e   : > { %v453_v35 = vmax.f32 %v446_v29, 0.0  ;;  %v450_v37 = vadd.f32 %v449_v34, %v304_v27 }
 0x10f   : > { %v460_v38 = vadd.f32 %v456_v28, %v452_v31  ;;  %v454_v39 = vmax.f32 %v448_v33, 0.0 }
 0x110   : > { %v461_v41 = vadd.f32 %v457_v32, %v453_v35  ;;  %v455_v42 = vmax.f32 %v450_v37, 0.0 }
 0x111   : > { %464 = vst [vmem:[%s271_s11] sm:$0xff] %v460_v38  ;;  %v462_v43 = vadd.f32 %v458_v36, %v454_v39 }
 0x112   : > { %465 = vst [vmem:[%s271_s11 + $0x8] sm:$0xff] %v461_v41  ;;  %v463_v44 = vadd.f32 %v459_v40, %v455_v42 }
 0x113   : > { %466 = vst [vmem:[%s271_s11 + $0x10] sm:$0xff] %v462_v43 }
 0x114   : > { %467 = vst [vmem:[%s271_s11 + $0x18] sm:$0xff] %v463_v44 }
 0x115 PF: > { %s14_s17 = sadd.s32 1, %s687_s17   ;;  %s792_s15 = smov %s683_s16 }
 0x116   : > { %p11_p5 = scmp.ge.s32.totalorder %s14_s17, 4   ;;  %s793_s16 = smov %s795_s18 }
 0x118   :  { %13 = sbr.rel (!%p11_p5) target bundleno = 2 (0x2), region = 69 }

// kernel: sci_forward.43
= control target key start
LH: loop header
LB: loop body
LE: loop exit
PB: predicated region body
PF: predicated region fallthrough
CT: control target
= control target key end

     0   :  { %s918_s21 = smov 0   ;;  %s920_s22 = smov 0   ;;  %s990_s0 = inlined_call_operand.vmem [shape: bf16[2,144,256], index: 0, kind: input, shape index: {}]   ;;  %s991_s1 = inlined_call_operand.vmem [shape: bf16[3,144], index: 1, kind: input, shape index: {}]   ;;  %s992_s2 = inlined_call_operand.vmem [shape: f32[3,1], index: 2, kind: input, shape index: {}]   ;;  %s993_s3 = inlined_call_operand.vmem [shape: f32[2,3,256], index: 3, kind: input, shape index: {}]   ;;  %s994_s4 = inlined_call_operand.vmem [shape: f32[2,3,256], index: 4, kind: input, shape index: {}]   ;;  %s995_s5 = inlined_call_operand.vmem [shape: f32[2,3,256], index: 5, kind: output, shape index: {0}]   ;;  %s996_s6 = inlined_call_operand.vmem [shape: f32[2,3,256], index: 6, kind: output, shape index: {1}]  }
   0x1   :  { %s922_s23 = smov 0  }
   0x2 LB: > { %s29_s24 = sadd.s32 1, %s876_s22  ;;  %p758_p0 = scmp.ge.s32.totalorder %s880_s23, 1  ;;  %s880_s23 = sphi %s922_s23, %s17_s23   ;;  %s876_s22 = sphi %s920_s22, %s998_s22   ;;  %s872_s21 = sphi %s918_s21, %s997_s21  }
   0x3   : > { %p31_p1 = scmp.ge.s32.totalorder %s29_s24, 2  ;;  %p272_p2 = scmp.lt.s32.totalorder %s880_s23, 3 }
   0x5   : > { %s1000_s24 = smov (%p31_p1, %s29_s24), 0  ;;  %p273_p3 = pnand %p758_p0, %p272_p2 }
   0x6   : > { %p338_p4 = scmp.lt.s32.totalorder (!%p273_p3), %s872_s21, 1  ;;  %v768_v0 = vld.sshfl [vmem:[%s991_s1] sm:$0x33 pattern:$0x76325410] (!%p273_p3)  ;;  %vm513_vm0 = vcmask (!%p273_p3), 130048  }
   0x7   : > { %276 = sbr.rel (%p273_p3) target bundleno = 303 (0x12f), region = 40  ;;  %v421_v1 = vcombine.high (!%p273_p3), %v768_v0, %v768_v0  ;;  %v407_v2 = vld [vmem:[%s992_s2] sm:$0x7] (!%p273_p3)  ;;  %v882_v3 = vmov (!%p273_p3), 0  }
   0x8   : > { %822 = vset.pattern.permute.xlu0 (!%p273_p3), %v882_v3 }
   0x9   : > { %787 = vmatprep.mubr.msk.bf16.mxu0 (!%p273_p3), %vm513_vm0, %v421_v1  ;;  %410 = vperm.xlu0 (!%p273_p3), %822, %v407_v2  }
   0xe   : > { %s1002_s21 = smov (!%p338_p4, %s872_s21), 1 }
   0xf   : > { %s796_s29 = smul.u32 144, %s1002_s21  ;;  %s792_s9 = sshll.u32 %s1002_s21, 3 }
  0x10   : > { %s355_s12 = scalar_lea.vmem %s993_s3, %s792_s9  ;;  %s365_s15 = scalar_lea.vmem %s994_s4, %s792_s9 }
  0x11   : > { %s948_s8 = scalar_lea.vmem %s990_s0, %s796_s29  ;;  %v570_v37 = vld [vmem:[%s355_s12] sm:$0x77]  ;;  %s375_s18 = scalar_lea.vmem %s995_s5, %s792_s9 }
  0x12   : > { %v823_v4 = vld [vmem:[%s948_s8 + $0x4] ss:$8 sps:$4 sm:$0xff]   ;;  %v825_v5 = vld [vmem:[%s948_s8] ss:$8 sps:$4 sm:$0xff]   ;;  %v826_v6 = vld [vmem:[%s948_s8 + $0x14] ss:$8 sps:$4 sm:$0xff]   ;;  %s385_s21 = scalar_lea.vmem %s996_s6, %s792_s9 }
  0x13   : > { %517 = vmatprep.subr.bf16.mxu0 %v823_v4  ;;  %v828_v7 = vld [vmem:[%s948_s8 + $0x10] ss:$8 sps:$4 sm:$0xff]   ;;  %v829_v8 = vld [vmem:[%s948_s8 + $0x24] ss:$8 sps:$4 sm:$0xff]   ;;  %v831_v9 = vld [vmem:[%s948_s8 + $0x20] ss:$8 sps:$4 sm:$0xff]  }
  0x14   : > { %518 = vmatpush1.bf16.msra.mxu0 %v825_v5  ;;  %v832_v10 = vld [vmem:[%s948_s8 + $0x34] ss:$8 sps:$4 sm:$0xff]   ;;  %v834_v11 = vld [vmem:[%s948_s8 + $0x30] ss:$8 sps:$4 sm:$0xff]   ;;  %v835_v12 = vld [vmem:[%s948_s8 + $0x44] ss:$8 sps:$4 sm:$0xff]  }
  0x15   : > { %519 = vmatprep.subr.bf16.mxu0 %v826_v6  ;;  %v837_v13 = vld [vmem:[%s948_s8 + $0x40] ss:$8 sps:$4 sm:$0xff]   ;;  %v838_v14 = vld [vmem:[%s948_s8 + $0x54] ss:$8 sps:$4 sm:$0xff]   ;;  %v840_v15 = vld [vmem:[%s948_s8 + $0x50] ss:$8 sps:$4 sm:$0xff]  }
  0x16   : > { %v841_v16 = vld [vmem:[%s948_s8 + $0x64] ss:$8 sps:$4 sm:$0xff]   ;;  %v843_v17 = vld [vmem:[%s948_s8 + $0x60] ss:$8 sps:$4 sm:$0xff]   ;;  %v844_v18 = vld [vmem:[%s948_s8 + $0x74] ss:$8 sps:$4 sm:$0xff]  }
  0x17   : > { %v846_v19 = vld [vmem:[%s948_s8 + $0x70] ss:$8 sps:$4 sm:$0xff]   ;;  %v847_v20 = vld [vmem:[%s948_s8 + $0x84] ss:$8 sps:$4 sm:$0xff]   ;;  %v849_v21 = vld [vmem:[%s948_s8 + $0x80] ss:$8 sps:$4 sm:$0xff]  }
  0x18   : > { %520 = vmatpush1.bf16.msra.mxu0 %v828_v7  ;;  %v576_v39 = vld [vmem:[%s365_s15] sm:$0x77] }
  0x19   : > { %521 = vmatprep.subr.bf16.mxu0 %v829_v8 }
  0x1c   : > { %522 = vmatpush1.bf16.msra.mxu0 %v831_v9 }
  0x1d   : > { %523 = vmatprep.subr.bf16.mxu0 %v832_v10 }
  0x20   : > { %524 = vmatpush1.bf16.msra.mxu0 %v834_v11 }
  0x21   : > { %525 = vmatprep.subr.bf16.mxu0 %v835_v12 }
  0x24   : > { %526 = vmatpush1.bf16.msra.mxu0 %v837_v13 }
  0x25   : > { %527 = vmatprep.subr.bf16.mxu0 %v838_v14 }
  0x28   : > { %528 = vmatpush1.bf16.msra.mxu0 %v840_v15 }
  0x29   : > { %529 = vmatprep.subr.bf16.mxu0 %v841_v16 }
  0x2c   : > { %530 = vmatpush1.bf16.msra.mxu0 %v843_v17 }
  0x2d   : > { %531 = vmatprep.subr.bf16.mxu0 %v844_v18 }
  0x30   : > { %532 = vmatpush1.bf16.msra.mxu0 %v846_v19 }
  0x31   : > { %533 = vmatprep.subr.bf16.mxu0 %v847_v20 }
  0x34   : > { %534 = vmatpush1.bf16.msra.mxu0 %v849_v21 }
  0x37   : > { %550 = vmatmul.mubr.bf16.vlgmr.msra.gmra.mrb[0].mxu0 %v768_v0 }
  0x88   : > { %v411_v22 = vpop.permute.xlu0 %410 }
 0x10a   : > { %v551_v23 = vpop.f32.mrb[0].mxu0 }
 0x10b   : > { %v552_v24 = vadd.f32 %v551_v23, %v411_v22  ;;  %v553_v25 = vpop.f32.mrb[1].mxu0 }
 0x10c   : > { %v554_v26 = vadd.f32 %v553_v25, %v411_v22  ;;  %v555_v27 = vpop.f32.mrb[2].mxu0 }
 0x10d   : > { %v788_v28 = vmul.f32 -1.442695, %v552_v24  ;;  %v556_v29 = vpop.f32.mrb[3].mxu0 }
 0x10e   : > { %v789_v30 = vmul.f32 -1.442695, %v554_v26 }
 0x10f   : > { %850 = vpow2.f32 %v788_v28 }
 0x110   : > { %852 = vpow2.f32 %v789_v30 }
 0x119   : > { %v851_v31 = vpop.eup %850 }
 0x11a   : > { %v853_v32 = vpop.eup %852  ;;  %v564_v33 = vadd.f32 1.0, %v851_v31 }
 0x11b   : > { %v565_v34 = vadd.f32 1.0, %v853_v32 }
 0x11c   : > { %854 = vrcp.f32 %v564_v33 }
 0x11d   : > { %856 = vrcp.f32 %v565_v34 }
 0x126   : > { %v855_v35 = vpop.eup %854 }
 0x127   : > { %v857_v36 = vpop.eup %856 }
 0x128   : > { %v573_v38 = vcombine.low %v855_v35, %v857_v36 }
 0x12a   : > { %v575_v40 = vsub.f32 %v570_v37, %v573_v38 }
 0x12c   : > { %v577_v41 = vadd.f32 %v576_v39, %v575_v40  ;;  %v579_v42 = vand.u32 2147483647, %v575_v40 }
 0x12e   : > { %578 = vst [vmem:[%s375_s18] sm:$0x77] %v577_v41  ;;  %580 = vst [vmem:[%s385_s21] sm:$0x77] %v579_v42 }
 0x12f PF: > { %s17_s23 = sadd.s32 1, %s880_s23   ;;  %s997_s21 = smov %s876_s22 }
 0x130   : > { %p14_p5 = scmp.ge.s32.totalorder %s17_s23, 4   ;;  %s998_s22 = smov %s1000_s24 }
 0x132   :  { %16 = sbr.rel (!%p14_p5) target bundleno = 2 (0x2), region = 88 }

// kernel: sci_forward.65
= control target key start
LH: loop header
LB: loop body
LE: loop exit
PB: predicated region body
PF: predicated region fallthrough
CT: control target
= control target key end

     0   :  { %s1155_s0 = inlined_call_operand.vmem [shape: bf16[2,144,256], index: 0, kind: input, shape index: {}]   ;;  %s1156_s1 = inlined_call_operand.vmem [shape: bf16[3,144], index: 1, kind: input, shape index: {}]   ;;  %s1157_s2 = inlined_call_operand.vmem [shape: f32[3,1], index: 2, kind: input, shape index: {}]   ;;  %s1158_s3 = inlined_call_operand.vmem [shape: f32[2,3,256], index: 3, kind: input, shape index: {}]   ;;  %s1159_s4 = inlined_call_operand.vmem [shape: f32[2,3,256], index: 4, kind: input, shape index: {}]   ;;  %s1160_s5 = inlined_call_operand.hbm [shape: f32[2,3,256], index: 5, kind: output, shape index: {0}]   ;;  %s1161_s6 = inlined_call_operand.vmem [shape: f32[2,3,256], index: 6, kind: output, shape index: {1}]  }
   0x1   :  { %1162 = sst [smem:[#allocation5_spill]] %s1155_s0 }
   0x2   :  { %12 = vsyncpa [#allocation3], 0 }
   0x3   :  { %14 = vsyncpa [#allocation3 + $0x1], 0  ;;  %s1004_s21 = smov 0   ;;  %s1006_s22 = smov 0  }
   0x4   :  { %s1008_s23 = smov 0   ;;  %s1010_s24 = smov 0  }
   0x5   :  { %s1012_s25 = smov 0   ;;  %s1014_s26 = smov 0  }
   0x6 LB: > { %s750_s27 = sadd.s32 4294967295, %s965_s26   ;;  %s751_s28 = sadd.s32 4294967294, %s965_s26   ;;  %s965_s26 = sphi %s1014_s26, %s20_s26   ;;  %s961_s25 = sphi %s1012_s25, %s1170_s25   ;;  %s957_s24 = sphi %s1010_s24, %s1169_s24   ;;  %s953_s23 = sphi %s1008_s23, %s1168_s23   ;;  %s949_s22 = sphi %s1006_s22, %s1167_s22   ;;  %s945_s21 = sphi %s1004_s21, %s1166_s21  }
   0x7   : > { %s32_s29 = sadd.s32 1, %s961_s25  ;;  %s167_s30 = sadd.s32 1, %s953_s23 }
   0x8   : > { %p34_p0 = scmp.ge.s32.totalorder %s32_s29, 2  ;;  %p177_p1 = scmp.ne.s32.totalorder %s953_s23, %s949_s22 }
   0x9   : > { %p178_p2 = scmp.eq.s32.totalorder %s750_s27, 1  ;;  %p183_p3 = scmp.ne.s32.totalorder %s949_s22, %s945_s21 }
   0xa   : > { %s1172_s29 = smov (%p34_p0, %s32_s29), 0  ;;  %p184_p5 = scmp.eq.s32.totalorder %s751_s28, 1 }
   0xb   : > { %p1044_p4 = por %p178_p2, %p177_p1  ;;  %s162_s8 = ssub.s32 %s961_s25, %s1172_s29 }
   0xc   : > { %p754_p6 = scmp.ge.s32.totalorder %s965_s26, 1  ;;  %p165_p7 = scmp.eq.s32.totalorder %s162_s8, 0 }
   0xd   : > { %p1051_p8 = por %p184_p5, %p183_p3  ;;  %p275_p9 = scmp.lt.s32.totalorder %s965_s26, 3 }
   0xe   : > { %s1057_s10 = scalar_select %p165_p7, %s953_s23, %s167_s30  }
   0xf   : > { %p276_p10 = pnand %p754_p6, %p275_p9 }
  0x10   : > { %p337_p11 = scmp.lt.s32.totalorder (!%p276_p10), %s957_s24, 1  ;;  %v763_v0 = vld.sshfl [vmem:[%s1156_s1] sm:$0x33 pattern:$0x76325410] (!%p276_p10)  ;;  %vm503_vm0 = vcmask (!%p276_p10), 130048  }
  0x11   : > { %279 = sbr.rel (%p276_p10) target bundleno = 327 (0x147), region = 40  ;;  %v411_v1 = vcombine.high (!%p276_p10), %v763_v0, %v763_v0  ;;  %v397_v2 = vld [vmem:[%s1157_s2] sm:$0x7] (!%p276_p10)  ;;  %v967_v3 = vmov (!%p276_p10), 0   ;;  %s1165_s0 = sld [smem:[#allocation5_spill]] (!%p276_p10) }
  0x12   : > { %851 = vset.pattern.permute.xlu0 (!%p276_p10), %v967_v3  ;;  %s322_s20 = sand.u32 (!%p276_p10), 1, %s949_s22  }
  0x13   : > { %782 = vmatprep.mubr.msk.bf16.mxu0 (!%p276_p10), %vm503_vm0, %v411_v1  ;;  %400 = vperm.xlu0 (!%p276_p10), %851, %v397_v2   ;;  %s755_s28 = sshll.u32 (!%p276_p10), %s322_s20, 3 }
  0x14   : > { %s324_s17 = scalar_lea.vmem (!%p276_p10), [#allocation2], %s755_s28 }
  0x15   : > { %s597_s18 = sshll.u32 (!%p276_p10), %s324_s17, 4  ;;  %s1110_s18 = int_to_ptr.vmem [resolvable:$true] %s597_s18 }
  0x16   : > { %s887_s28 = scalar_lea.vmem (!%p276_p10), %s1110_s18, 128 }
  0x17   : > { %p888_p12 = scmp.ne.s32.totalorder (!%p276_p10), %s1110_s18, %s887_s28 }
  0x18   : > { %s1067_s15 = scalar_select %p337_p11, %s957_s24, 1 }
  0x19   : > { %p889_p13 = pnand %p888_p12, %p1044_p4 }
  0x1a   : > { %s794_s16 = smul.u32 144, %s1067_s15  ;;  %s790_s27 = sshll.u32 %s1067_s15, 3 }
  0x1b   : > { %s354_s11 = scalar_lea.vmem %s1158_s3, %s790_s27  ;;  %s364_s14 = scalar_lea.vmem %s1159_s4, %s790_s27 }
  0x1c   : > { %s1073_s19 = scalar_lea.vmem %s1165_s0, %s794_s16  ;;  %v560_v37 = vld [vmem:[%s354_s11] sm:$0x77]  ;;  %s793_s16 = sshll.u32 %s957_s24, 7 }
  0x1d   : > { %v852_v4 = vld [vmem:[%s1073_s19 + $0x4] ss:$8 sps:$4 sm:$0xff]   ;;  %v854_v5 = vld [vmem:[%s1073_s19] ss:$8 sps:$4 sm:$0xff]   ;;  %v855_v6 = vld [vmem:[%s1073_s19 + $0x14] ss:$8 sps:$4 sm:$0xff]   ;;  %s375_s0 = scalar_lea.vmem %s1161_s6, %s790_s27  ;;  %s1108_s12 = scalar_lea.hbm %s1160_s5, %s793_s16 }
  0x1e   : > { %507 = vmatprep.subr.bf16.mxu0 %v852_v4  ;;  %v857_v7 = vld [vmem:[%s1073_s19 + $0x10] ss:$8 sps:$4 sm:$0xff]   ;;  %v858_v8 = vld [vmem:[%s1073_s19 + $0x24] ss:$8 sps:$4 sm:$0xff]   ;;  %v860_v9 = vld [vmem:[%s1073_s19 + $0x20] ss:$8 sps:$4 sm:$0xff]   ;;  %p890_p0 = pneg %p889_p13 }
  0x1f   : > { %508 = vmatpush1.bf16.msra.mxu0 %v854_v5  ;;  %v861_v10 = vld [vmem:[%s1073_s19 + $0x34] ss:$8 sps:$4 sm:$0xff]   ;;  %v863_v11 = vld [vmem:[%s1073_s19 + $0x30] ss:$8 sps:$4 sm:$0xff]   ;;  %v864_v12 = vld [vmem:[%s1073_s19 + $0x44] ss:$8 sps:$4 sm:$0xff]  }
  0x20   : > { %509 = vmatprep.subr.bf16.mxu0 %v855_v6  ;;  %v866_v13 = vld [vmem:[%s1073_s19 + $0x40] ss:$8 sps:$4 sm:$0xff]   ;;  %v867_v14 = vld [vmem:[%s1073_s19 + $0x54] ss:$8 sps:$4 sm:$0xff]   ;;  %v869_v15 = vld [vmem:[%s1073_s19 + $0x50] ss:$8 sps:$4 sm:$0xff]  }
  0x21   : > { %v870_v16 = vld [vmem:[%s1073_s19 + $0x64] ss:$8 sps:$4 sm:$0xff]   ;;  %v872_v17 = vld [vmem:[%s1073_s19 + $0x60] ss:$8 sps:$4 sm:$0xff]   ;;  %v873_v18 = vld [vmem:[%s1073_s19 + $0x74] ss:$8 sps:$4 sm:$0xff]  }
  0x22   : > { %v875_v19 = vld [vmem:[%s1073_s19 + $0x70] ss:$8 sps:$4 sm:$0xff]   ;;  %v876_v20 = vld [vmem:[%s1073_s19 + $0x84] ss:$8 sps:$4 sm:$0xff]   ;;  %v878_v21 = vld [vmem:[%s1073_s19 + $0x80] ss:$8 sps:$4 sm:$0xff]  }
  0x23   : > { %510 = vmatpush1.bf16.msra.mxu0 %v857_v7  ;;  %v566_v39 = vld [vmem:[%s364_s14] sm:$0x77]  ;;  %s572_s24 = scalar_lea.sflag [#allocation3], %s322_s20  ;;  %s968_s27 = smov [#allocation2]  }
  0x24   : > { %511 = vmatprep.subr.bf16.mxu0 %v858_v8  ;;  %s891_s11 = sshll.u32 %s968_s27, 4  ;;  %s892_s11 = int_to_ptr.vmem [resolvable:$false] %s891_s11 }
  0x25   : > { %s893_s13 = scalar_lea.vmem %s892_s11, 256  ;;  %p894_p1 = scmp.lt.s32.totalorder %s1110_s18, %s892_s11 }
  0x26   : > { %p895_p2 = scmp.lt.s32.totalorder %s893_s13, %s887_s28 }
  0x27   : > { %512 = vmatpush1.bf16.msra.mxu0 %v860_v9 }
  0x28   : > { %513 = vmatprep.subr.bf16.mxu0 %v861_v10  ;;  %p896_p3 = por %p895_p2, %p894_p1 }
  0x2a   : > { %p897_p5 = pnand %p896_p3, %p890_p0 }
  0x2b   : > { %514 = vmatpush1.bf16.msra.mxu0 %v863_v11 }
  0x2c   : > { %515 = vmatprep.subr.bf16.mxu0 %v864_v12 }
  0x2f   : > { %516 = vmatpush1.bf16.msra.mxu0 %v866_v13 }
  0x30   : > { %517 = vmatprep.subr.bf16.mxu0 %v867_v14 }
  0x33   : > { %518 = vmatpush1.bf16.msra.mxu0 %v869_v15 }
  0x34   : > { %519 = vmatprep.subr.bf16.mxu0 %v870_v16 }
  0x37   : > { %520 = vmatpush1.bf16.msra.mxu0 %v872_v17 }
  0x38   : > { %521 = vmatprep.subr.bf16.mxu0 %v873_v18 }
  0x3b   : > { %522 = vmatpush1.bf16.msra.mxu0 %v875_v19 }
  0x3c   : > { %523 = vmatprep.subr.bf16.mxu0 %v876_v20 }
  0x3f   : > { %524 = vmatpush1.bf16.msra.mxu0 %v878_v21 }
  0x42   : > { %540 = vmatmul.mubr.bf16.vlgmr.msra.gmra.mrb[0].mxu0 %v763_v0 }
  0x92   : > { %v401_v22 = vpop.permute.xlu0 %400 }
 0x115   : > { %v541_v23 = vpop.f32.mrb[0].mxu0 }
 0x116   : > { %v542_v24 = vadd.f32 %v541_v23, %v401_v22  ;;  %v543_v25 = vpop.f32.mrb[1].mxu0 }
 0x117   : > { %v544_v26 = vadd.f32 %v543_v25, %v401_v22  ;;  %v545_v27 = vpop.f32.mrb[2].mxu0 }
 0x118   : > { %v783_v28 = vmul.f32 -1.442695, %v542_v24  ;;  %v546_v29 = vpop.f32.mrb[3].mxu0 }
 0x119   : > { %v784_v30 = vmul.f32 -1.442695, %v544_v26 }
 0x11a   : > { %879 = vpow2.f32 %v783_v28 }
 0x11b   : > { %881 = vpow2.f32 %v784_v30 }
 0x124   : > { %v880_v31 = vpop.eup %879 }
 0x125   : > { %v882_v32 = vpop.eup %881  ;;  %v554_v33 = vadd.f32 1.0, %v880_v31 }
 0x126   : > { %v555_v34 = vadd.f32 1.0, %v882_v32 }
 0x127   : > { %883 = vrcp.f32 %v554_v33 }
 0x128   : > { %885 = vrcp.f32 %v555_v34 }
 0x131   : > { %v884_v35 = vpop.eup %883 }
 0x132   : > { %v886_v36 = vpop.eup %885 }
 0x133   : > { %v563_v38 = vcombine.low %v884_v35, %v886_v36 }
 0x135   : > { %v565_v40 = vsub.f32 %v560_v37, %v563_v38 }
 0x137   : > { %v567_v41 = vadd.f32 %v566_v39, %v565_v40  ;;  %v569_v42 = vand.u32 2147483647, %v565_v40 }
 0x139   : > { %568 = vst [vmem:[%s324_s17] sm:$0x77] %v567_v41  ;;  %570 = vst [vmem:[%s375_s0] sm:$0x77] %v569_v42 }
 0x13a   : > { %900 = shalt.err (!%p897_p5)
}
 0x13b   : > { %s901_s0 = scalar_lea.hbm %s1108_s12, 128  ;;  %s905_s16 = scalar_lea.hbm %s1160_s5, 256 }
 0x13c   : > { %p902_p6 = scmp.ne.s32.totalorder %s1108_s12, %s901_s0  ;;  %p906_p10 = scmp.lt.u32.totalorder %s1108_s12, %s1160_s5 }
 0x13d   : > { %p907_p11 = scmp.lt.u32.totalorder %s905_s16, %s901_s0  ;;  %p909_p13 = scmp.lt.u32.totalorder %s901_s0, %s1108_s12 }
 0x13e   : > { %p903_p7 = pnand %p902_p6, %p1044_p4 }
 0x13f   : > { %p908_p12 = por %p907_p11, %p906_p10 }
 0x140   : > { %p904_p9 = pneg %p903_p7 }
 0x141   : > { %p910_p0 = por %p909_p13, %p908_p12 }
 0x143   : > { %p911_p1 = pnand %p910_p0, %p904_p9 }
 0x145   : > { %914 = shalt.err (!%p911_p1)
}
 0x146   : > { %795 = dma.vmem_to_hbm [thread:$0]  (%p1044_p4), %s1110_s18, 128, %s1108_s12, %s572_s24  }
 0x147 PF: > { %p801_p2 = scmp.ge.s32.totalorder %s965_s26, 2  ;;  %s613_s19 = sand.u32 1, %s945_s21  }
 0x148   : > { %s614_s30 = scalar_lea.sflag [#allocation3], %s613_s19 }
 0x149   : > { %p798_p3 = pnand %p801_p2, %p1051_p8 }
 0x14b   : > { %940 = dma.done.wait (!%p798_p3), %s614_s30, 128  }
 0x14c   : > { %942 = vsyncadd (!%p798_p3), %s614_s30, 4294967168  ;;  %s20_s26 = sadd.s32 1, %s965_s26   ;;  %s1166_s21 = smov %s949_s22 }
 0x14d   : > { %p17_p5 = scmp.ge.s32.totalorder %s20_s26, 4   ;;  %s1167_s22 = smov %s953_s23 }
 0x14e   : > { %s1168_s23 = smov %s1057_s10  ;;  %s1169_s24 = smov %s961_s25 }
 0x14f   : > { %s1170_s25 = smov %s1172_s29  ;;  %19 = sbr.rel (!%p17_p5) target bundleno = 6 (0x6), region = 93 }
 0x156   :  { %631 = vsyncpa [#allocation3], 1 }
 0x157   :  { %633 = vsyncpa [#allocation3 + $0x1], 1 }

</bundles_post_ra>
